<compile_context>
chip_gen: v7x
topology: tpu7x:2x2x1
jax: 0.10.0
libtpu: 0.0.40
codegen_flags: <defaults>
</compile_context>

<pallas_src>
import functools
import math

import jax
import jax.numpy as jnp
from jax import lax
from jax.experimental import pallas as pl
from jax.experimental.pallas import tpu as pltpu


def _round_up(x, m):
    return (x + m - 1) // m * m


def _gate_reorder(w):
    """Reorder PyTorch LSTM gate blocks [i, f, g, o] -> [i, f, o, g] along axis 0."""
    H = w.shape[0] // 4
    return jnp.concatenate([w[:2 * H], w[3 * H:], w[2 * H:3 * H]], axis=0)


def _is_v7x():
    try:
        return "v7" in jax.devices()[0].device_kind.lower()
    except Exception:
        return False


def _vmem_capacity_bytes():
    try:
        return int(pltpu.get_tpu_info().vmem_capacity_bytes)
    except Exception:
        return 64 * 1024 * 1024        # conservative fallback (v7x per-core size)


# ----------------------------------------------------------------------------------
# Pallas kernel: one seq-chunk of `ndir` stacked LSTM directions.
#   pre_ref : (ts, bsc, 4H)  bf16  precomputed x@W_ih.T + b (gate order i,f,o,g)
#   u_ref   : (ndir, H, 4H)  bf16  fused recurrent weights, fully VMEM-resident
#   hseq_ref: (ts//p, bsc, p*H) f32  lane-packed per-step hidden states
#   h_sc/c_sc: (bsc, H) f32  recurrent state, persistent across the seq grid axis
# ----------------------------------------------------------------------------------
def _lstm_stack_kernel(pre_ref, u_ref, hseq_ref, h_sc, c_sc, *, ts, H, p, unroll):
    d = pl.program_id(0)
    s = pl.program_id(2)

    @pl.when(s == 0)
    def _init():
        h_sc[...] = jnp.zeros_like(h_sc)
        c_sc[...] = jnp.zeros_like(c_sc)

    u = u_ref[d]                       # (H, 4H) bf16, single VMEM copy (no double-buffer)

    def step(tq, carry):
        for j in range(p):             # static: pack p timesteps into one p*H-lane out row
            t = tq * p + j
            h = h_sc[...]
            gates = pre_ref[t].astype(jnp.float32) + jnp.dot(
                h.astype(u.dtype), u, preferred_element_type=jnp.float32)   # (bsc, 4H)
            sig = jax.nn.sigmoid(gates[:, :3 * H])        # fused i, f, o
            i_t = sig[:, :H]
            f_t = sig[:, H:2 * H]
            o_t = sig[:, 2 * H:3 * H]
            g_t = jnp.tanh(gates[:, 3 * H:])
            c_new = f_t * c_sc[...] + i_t * g_t
            h_new = o_t * jnp.tanh(c_new)
            c_sc[...] = c_new
            h_sc[...] = h_new
            hseq_ref[tq, :, j * H:(j + 1) * H] = h_new
        return carry

    lax.fori_loop(0, ts // p, step, 0, unroll=unroll)


# ----------------------------------------------------------------------------------
# One layer: all directions in a single pallas_call (time-major in, time-major out).
# ----------------------------------------------------------------------------------
def _lstm_stack_pallas(x_dirs, par_dirs, *, seq_chunk=None, batch_chunks=None):
    """x_dirs: list of (seq, bs, in) f32 arrays (direction-prepared, time-major).
    Returns (ndir, seq, bs, H) f32 hidden sequences, time-major."""
    ndir = len(x_dirs)
    seq, bs, _ = x_dirs[0].shape
    H = par_dirs[0]['w_hh'].shape[1]

    # Hoisted input projection (ONE matmul per direction, DEFAULT precision), emitted
    # directly in time-major (seq, bs, 4H) layout with gate order [i, f, o, g].
    pre_dirs, u_dirs = [], []
    for x_d, pp in zip(x_dirs, par_dirs):
        w_ih = _gate_reorder(pp['w_ih'].astype(jnp.float32))                   # (4H, in)
        b = _gate_reorder((pp['b_ih'] + pp['b_hh']).astype(jnp.float32))       # (4H,)
        pre = jnp.dot(x_d.reshape(seq * bs, -1).astype(jnp.float32), w_ih.T) + b
        pre_dirs.append(pre.reshape(seq, bs, 4 * H))
        u_dirs.append(_gate_reorder(pp['w_hh'].astype(jnp.float32)).T)         # (H, 4H)

    pre_all = jnp.stack(pre_dirs, axis=0).astype(jnp.bfloat16)   # (ndir, seq, bs, 4H)
    u_all = jnp.stack(u_dirs, axis=0).astype(jnp.bfloat16)       # (ndir, H, 4H)

    # Lane-packing factor: pack p timesteps per output row so stores are lane-dense.
    p = max(1, min(8, 128 // H)) if H < 128 else 1

    # Batch chunking only buys parallelism on v7x's 2 TensorCores, and only when the
    # direction axis does not already provide the 2-way split.  v5e/v6e: 1 chunk.
    if batch_chunks is None:
        nb = 2 if (_is_v7x() and ndir == 1 and bs >= 16) else 1
    else:
        nb = batch_chunks
    bsc = _round_up(max(1, -(-bs // nb)), 16 if nb > 1 else 8)
    bs_p = bsc * nb

    # seq-chunk sizing against the real VMEM capacity of this generation.
    vmem_cap = _vmem_capacity_bytes()
    tile_budget = int(vmem_cap * 0.55)
    bytes_per_t = bsc * H * 24         # pre: 2 buf * 4H * bf16 (16H) + out: 2 buf * H * f32 (8H)
    fixed = u_all.size * 2 + 2 * bsc * H * 4 + (2 << 20)
    seq_al = _round_up(seq, p)
    if seq_chunk is None:
        ts = max(p, min(seq_al, (tile_budget - fixed) // bytes_per_t))
    else:
        ts = max(p, min(seq_chunk, seq_al))
    ts = max(p, (ts // p) * p)
    seq_p = _round_up(seq, ts)
    ns = seq_p // ts

    pre_all = jnp.pad(pre_all, ((0, 0), (0, seq_p - seq), (0, bs_p - bs), (0, 0)))

    # Unrolling a serially-dependent loop only buys LLO scheduling overlap; back off as
    # the per-step live state grows to avoid vreg spills.
    body_bytes = p * bsc * 4 * H * 4
    unroll = 8 if body_bytes <= 32 * 1024 else (4 if body_bytes <= 128 * 1024 else 1)
    unroll = max(1, min(ts // p, unroll))

    kernel = functools.partial(_lstm_stack_kernel, ts=ts, H=H, p=p, unroll=unroll)
    hseq = pl.pallas_call(
        kernel,
        out_shape=jax.ShapeDtypeStruct((ndir, seq_p // p, bs_p, p * H), jnp.float32),
        grid_spec=pltpu.PrefetchScalarGridSpec(
            num_scalar_prefetch=0,
            grid=(ndir, nb, ns),
            in_specs=[
                pl.BlockSpec((None, ts, bsc, 4 * H), lambda d, b, s: (d, s, b, 0)),
                pl.BlockSpec(memory_space=pltpu.MemorySpace.VMEM),   # whole weight resident
            ],
            out_specs=pl.BlockSpec((None, ts // p, bsc, p * H),
                                   lambda d, b, s: (d, s, b, 0)),
            scratch_shapes=[
                pltpu.VMEM((bsc, H), jnp.float32),   # h state (persists across seq chunks)
                pltpu.VMEM((bsc, H), jnp.float32),   # c state
            ],
        ),
        compiler_params=pltpu.CompilerParams(
            # TODO(synk): verify the leading "parallel" axis actually shards across the
            # two TensorCores on v7x (CORE_PARALLEL / core_map fallback if not).
            dimension_semantics=("parallel", "parallel", "arbitrary"),
            vmem_limit_bytes=int(vmem_cap * 0.85),
        ),
    )(pre_all, u_all)

    if p > 1:   # unpack lane-packed timesteps (layout plumbing only)
        hseq = hseq.reshape(ndir, seq_p // p, bs_p, p, H)
        hseq = hseq.transpose(0, 1, 3, 2, 4).reshape(ndir, seq_p, bs_p, H)
    return hseq[:, :seq, :bs]          # (ndir, seq, bs, H), time-major


# ----------------------------------------------------------------------------------
# Packed-sequence bookkeeping (wrapper glue), time-major.
# ----------------------------------------------------------------------------------
def _reverse_within_length_tm(x_tm, seq_lens):
    """rev[t, b] = x[len_b - 1 - t, b] for t < len_b, else 0 (time-major)."""
    seq = x_tm.shape[0]
    t = jnp.arange(seq)[:, None]                                   # (seq, 1)
    idx = jnp.clip(seq_lens[None, :] - 1 - t, 0, seq - 1)          # (seq, bs)
    rev = jnp.take_along_axis(x_tm, jnp.broadcast_to(idx[:, :, None], x_tm.shape), axis=0)
    valid = (t < seq_lens[None, :])[:, :, None]
    return jnp.where(valid, rev, 0.0)


def dynamic_lstm_forward(params, inputs, *, num_layers, bidirectional):
    """Pallas implementation of DynamicLSTM.forward.  Returns (y, [])."""
    x = inputs['event_representation'].astype(jnp.float32)
    seq_lens = jnp.asarray(inputs['sequence_lengths'], jnp.int32)
    bs, seq, _ = x.shape

    # Time-major through the whole stack: only x and the final output are transposed.
    layer_in = x.transpose(1, 0, 2)                                # (seq, bs, in)
    valid = (jnp.arange(seq)[:, None] < seq_lens[None, :])[:, :, None]

    for layer in range(num_layers):
        if bidirectional:
            x_rev = _reverse_within_length_tm(layer_in, seq_lens)
            hs = _lstm_stack_pallas([layer_in, x_rev],
                                    [params[(layer, 0)], params[(layer, 1)]])
            y_f = jnp.where(valid, hs[0], 0.0)          # packed LSTM never emits padded steps
            y_b = _reverse_within_length_tm(hs[1], seq_lens)   # un-reverse + mask
            layer_in = jnp.concatenate([y_f, y_b], axis=-1)
        else:
            hs = _lstm_stack_pallas([layer_in], [params[(layer, 0)]])
            layer_in = jnp.where(valid, hs[0], 0.0)
        # TODO(synk): nn.LSTM training-mode inter-layer dropout not applied (eval semantics).

    y = layer_in.transpose(1, 0, 2)                                # (bs, seq, ndir*H)

    # pad_packed_sequence pads only up to max(seq_lens); slice only when lengths are
    # concrete so the function stays jit-compatible (extra steps are zero-masked anyway).
    # The sort/unsort of the original forward is an identity on the result and is skipped.
    try:
        t_out = int(jax.device_get(jnp.max(seq_lens)))
        y = y[:, :t_out]
    except Exception:
        pass
    return y, []


# ----------------------------------------------------------------------------------
# Plain-JAX reference mirroring packed nn.LSTM semantics (per-sample, exact lengths).
# ----------------------------------------------------------------------------------
def _ref_lstm_dir(x_seq, w_ih, w_hh, b_ih, b_hh):
    L = x_seq.shape[0]
    H = w_hh.shape[1]
    h = jnp.zeros((H,), jnp.float32)
    c = jnp.zeros((H,), jnp.float32)
    outs = []
    for t in range(L):
        g = (jnp.dot(w_ih, x_seq[t], precision=jax.lax.Precision.HIGHEST)
             + jnp.dot(w_hh, h, precision=jax.lax.Precision.HIGHEST)
             + b_ih + b_hh)
        i = jax.nn.sigmoid(g[:H])
        f = jax.nn.sigmoid(g[H:2 * H])
        gg = jnp.tanh(g[2 * H:3 * H])
        o = jax.nn.sigmoid(g[3 * H:])
        c = f * c + i * gg
        h = o * jnp.tanh(c)
        outs.append(h)
    return jnp.stack(outs, axis=0) if outs else jnp.zeros((0, H), jnp.float32)


def dynamic_lstm_reference(params, inputs, *, num_layers, bidirectional):
    x = jnp.asarray(inputs['event_representation'], jnp.float32)
    lens = [int(l) for l in inputs['sequence_lengths']]
    bs = x.shape[0]
    t_out = max(lens)
    seqs = [x[b, :lens[b]] for b in range(bs)]
    for layer in range(num_layers):
        new_seqs = []
        for b in range(bs):
            p = params[(layer, 0)]
            y_f = _ref_lstm_dir(seqs[b], p['w_ih'], p['w_hh'], p['b_ih'], p['b_hh'])
            if bidirectional:
                p = params[(layer, 1)]
                y_b = _ref_lstm_dir(seqs[b][::-1], p['w_ih'], p['w_hh'],
                                    p['b_ih'], p['b_hh'])[::-1]
                y = jnp.concatenate([y_f, y_b], axis=-1)
            else:
                y = y_f
            new_seqs.append(y)
        seqs = new_seqs
    h_out = seqs[0].shape[-1]
    out = jnp.zeros((bs, t_out, h_out), jnp.float32)
    for b in range(bs):
        out = out.at[b, :lens[b]].set(seqs[b])
    return out


# ----------------------------------------------------------------------------------
# Module wrapper (mirrors DynamicLSTM / nn.LSTM parameterisation and init).
# ----------------------------------------------------------------------------------
class DynamicLSTMPallas:
    def __init__(self, config, key):
        self.input_size = config['input_size']
        self.hidden_size = config['hidden_size']
        self.num_layers = config['num_layers']
        self.bidirectional = config['bidirectional']
        self.dropout = config['dropout']
        num_dirs = 2 if self.bidirectional else 1
        H = self.hidden_size
        stdv = 1.0 / math.sqrt(H)
        params = {}
        k = key
        for layer in range(self.num_layers):
            in_sz = self.input_size if layer == 0 else H * num_dirs
            for d in range(num_dirs):
                k, k1, k2, k3, k4 = jax.random.split(k, 5)
                params[(layer, d)] = {
                    'w_ih': jax.random.uniform(k1, (4 * H, in_sz), jnp.float32, -stdv, stdv),
                    'w_hh': jax.random.uniform(k2, (4 * H, H), jnp.float32, -stdv, stdv),
                    'b_ih': jax.random.uniform(k3, (4 * H,), jnp.float32, -stdv, stdv),
                    'b_hh': jax.random.uniform(k4, (4 * H,), jnp.float32, -stdv, stdv),
                }
        self.params = params

    def __call__(self, inputs, mask):
        # mask accepted for API parity; lengths are read from inputs, as in the original.
        return dynamic_lstm_forward(self.params, inputs,
                                    num_layers=self.num_layers,
                                    bidirectional=self.bidirectional)


if __name__ == "__main__":
    key = jax.random.PRNGKey(0)
    k_x, k_par = jax.random.split(key)

    bs, seq, input_size = 4, 8, 6
    config = {
        'input_size': input_size,
        'hidden_size': 32,
        'num_layers': 2,
        'dropout': 0.0,
        'bidirectional': True,
    }

    x = jax.random.normal(k_x, (bs, seq, input_size), dtype=jnp.float32)
    seq_lens = jnp.array([8, 5, 3, 8], dtype=jnp.int32)
    inputs = {'event_representation': x, 'sequence_lengths': seq_lens}
    mask = (jnp.arange(seq)[None, :] < seq_lens[:, None]).astype(jnp.float32)

    model = DynamicLSTMPallas(config, k_par)

    y, extra = model(inputs, mask)
    jax.block_until_ready(y)

    y_ref = dynamic_lstm_reference(model.params, inputs,
                                   num_layers=config['num_layers'],
                                   bidirectional=config['bidirectional'])
    num_dirs = 2 if config['bidirectional'] else 1
    assert y.shape == (bs, int(jnp.max(seq_lens)), config['hidden_size'] * num_dirs)
    assert extra == []
    err = float(jnp.max(jnp.abs(y - y_ref)))
    # bf16 streaming of pre / recurrent weight (+ DEFAULT-precision projection) -> 3e-2 budget.
    assert jnp.allclose(y, y_ref, atol=3e-2, rtol=3e-2), err

    print("KERNEL_OK")
</pallas_src>

<mosaic_0001>
module attributes {stable_mosaic.version = 11 : i64} {
  func.func @_lstm_stack_kernel(%arg0: i32, %arg1: i32, %arg2: i32, %arg3: memref<1x8x8x128xbf16, #tpu.memory_space<vmem>>, %arg4: memref<2x32x128xbf16, #tpu.memory_space<vmem>>, %arg5: memref<1x2x8x128xf32, #tpu.memory_space<vmem>>, %arg6: memref<8x32xf32, #tpu.memory_space<vmem>>, %arg7: memref<8x32xf32, #tpu.memory_space<vmem>>) attributes {dimension_semantics = [#tpu.dimension_semantics<parallel>, #tpu.dimension_semantics<parallel>, #tpu.dimension_semantics<arbitrary>], iteration_bounds = array<i64: 2, 1, 1>, scalar_prefetch = 0 : i64, scratch_operands = 2 : i64, tpu.core_type = #tpu.core_type<tc>, window_params = [{transform_indices = @transform_0, window_bounds = array<i64: 1, 8, 8, 128>}, {pipeline_mode = #tpu.pipeline_mode<synchronous>, transform_indices = @transform_1, window_bounds = array<i64: 2, 32, 128>}, {transform_indices = @transform_2, window_bounds = array<i64: 1, 2, 8, 128>}]} {
    %c0_i32 = arith.constant 0 : i32
    %0 = arith.cmpi eq, %arg2, %c0_i32 : i32
    %1 = arith.extui %0 : i1 to i32
    %c0_i32_0 = arith.constant 0 : i32
    %2 = arith.cmpi ne, %1, %c0_i32_0 : i32
    scf.if %2 {
      %cst_141 = arith.constant 0.000000e+00 : f32
      %270 = vector.broadcast %cst_141 : f32 to vector<8x32xf32>
      %c0_142 = arith.constant 0 : index
      %c0_143 = arith.constant 0 : index
      %271 = vector.load %arg6[%c0_142, %c0_143] : memref<8x32xf32, #tpu.memory_space<vmem>>, vector<8x32xf32>
      tpu.vector_store %arg6[%c0_142, %c0_143], %270 {strides = array<i32>} : memref<8x32xf32, #tpu.memory_space<vmem>>, vector<8x32xf32>,
      %cst_144 = arith.constant 0.000000e+00 : f32
      %272 = vector.broadcast %cst_144 : f32 to vector<8x32xf32>
      %c0_145 = arith.constant 0 : index
      %c0_146 = arith.constant 0 : index
      %273 = vector.load %arg7[%c0_145, %c0_146] : memref<8x32xf32, #tpu.memory_space<vmem>>, vector<8x32xf32>
      tpu.vector_store %arg7[%c0_145, %c0_146], %272 {strides = array<i32>} : memref<8x32xf32, #tpu.memory_space<vmem>>, vector<8x32xf32>,
    } else {
    }
    %3 = arith.index_cast %arg0 : i32 to index
    %c0 = arith.constant 0 : index
    %c0_1 = arith.constant 0 : index
    %4 = vector.load %arg4[%3, %c0, %c0_1] : memref<2x32x128xbf16, #tpu.memory_space<vmem>>, vector<1x32x128xbf16>
    %5 = vector.shape_cast %4 : vector<1x32x128xbf16> to vector<32x128xbf16>
    %c0_i32_2 = arith.constant 0 : i32
    %c4_i32 = arith.constant 4 : i32
    %6 = arith.muli %c0_i32_2, %c4_i32 : i32
    %c0_i32_3 = arith.constant 0 : i32
    %7 = arith.addi %6, %c0_i32_3 : i32
    %c0_4 = arith.constant 0 : index
    %c0_5 = arith.constant 0 : index
    %8 = vector.load %arg6[%c0_4, %c0_5] : memref<8x32xf32, #tpu.memory_space<vmem>>, vector<8x32xf32>
    %c0_6 = arith.constant 0 : index
    %9 = arith.index_cast %7 : i32 to index
    %c0_7 = arith.constant 0 : index
    %c0_8 = arith.constant 0 : index
    %10 = vector.load %arg3[%c0_6, %9, %c0_7, %c0_8] : memref<1x8x8x128xbf16, #tpu.memory_space<vmem>>, vector<1x1x8x128xbf16>
    %11 = vector.shape_cast %10 : vector<1x1x8x128xbf16> to vector<8x128xbf16>
    %12 = arith.extf %11 : vector<8x128xbf16> to vector<8x128xf32>
    %13 = arith.truncf %8 : vector<8x32xf32> to vector<8x32xbf16>
    %cst = arith.constant dense<0.000000e+00> : vector<8x128xf32>
    %14 = tpu.matmul %13, %5, %cst {dimension_numbers = #tpu.dot_dimension_numbers<[1], [0], [0], [1], [0, 0, 1, 1], [], []>} : vector<8x32xbf16>, vector<32x128xbf16>, vector<8x128xf32> -> vector<8x128xf32>
    %15 = arith.addf %12, %14 : vector<8x128xf32>
    %16 = vector.extract_strided_slice %15 {offsets = [0, 0], sizes = [8, 96], strides = [1, 1]} : vector<8x128xf32> to vector<8x96xf32>
    %17 = arith.negf %16 : vector<8x96xf32>
    %18 = math.exp %17 : vector<8x96xf32>
    %cst_9 = arith.constant 1.000000e+00 : f32
    %19 = vector.broadcast %cst_9 : f32 to vector<8x96xf32>
    %20 = arith.addf %19, %18 : vector<8x96xf32>
    %21 = arith.divf %19, %20 : vector<8x96xf32>
    %22 = vector.extract_strided_slice %21 {offsets = [0, 0], sizes = [8, 32], strides = [1, 1]} : vector<8x96xf32> to vector<8x32xf32>
    %23 = vector.extract_strided_slice %21 {offsets = [0, 32], sizes = [8, 32], strides = [1, 1]} : vector<8x96xf32> to vector<8x32xf32>
    %24 = vector.extract_strided_slice %21 {offsets = [0, 64], sizes = [8, 32], strides = [1, 1]} : vector<8x96xf32> to vector<8x32xf32>
    %25 = vector.extract_strided_slice %15 {offsets = [0, 96], sizes = [8, 32], strides = [1, 1]} : vector<8x128xf32> to vector<8x32xf32>
    %26 = math.tanh %25 : vector<8x32xf32>
    %c0_10 = arith.constant 0 : index
    %c0_11 = arith.constant 0 : index
    %27 = vector.load %arg7[%c0_10, %c0_11] : memref<8x32xf32, #tpu.memory_space<vmem>>, vector<8x32xf32>
    %28 = arith.mulf %23, %27 : vector<8x32xf32>
    %29 = arith.mulf %22, %26 : vector<8x32xf32>
    %30 = arith.addf %28, %29 : vector<8x32xf32>
    %31 = math.tanh %30 : vector<8x32xf32>
    %32 = arith.mulf %24, %31 : vector<8x32xf32>
    %c0_12 = arith.constant 0 : index
    %c0_13 = arith.constant 0 : index
    %33 = vector.load %arg7[%c0_12, %c0_13] : memref<8x32xf32, #tpu.memory_space<vmem>>, vector<8x32xf32>
    tpu.vector_store %arg7[%c0_12, %c0_13], %30 {strides = array<i32>} : memref<8x32xf32, #tpu.memory_space<vmem>>, vector<8x32xf32>,
    %c0_14 = arith.constant 0 : index
    %c0_15 = arith.constant 0 : index
    %34 = vector.load %arg6[%c0_14, %c0_15] : memref<8x32xf32, #tpu.memory_space<vmem>>, vector<8x32xf32>
    tpu.vector_store %arg6[%c0_14, %c0_15], %32 {strides = array<i32>} : memref<8x32xf32, #tpu.memory_space<vmem>>, vector<8x32xf32>,
    %c0_16 = arith.constant 0 : index
    %35 = arith.index_cast %c0_i32_2 : i32 to index
    %c0_17 = arith.constant 0 : index
    %c0_18 = arith.constant 0 : index
    %36 = vector.load %arg5[%c0_16, %35, %c0_17, %c0_18] : memref<1x2x8x128xf32, #tpu.memory_space<vmem>>, vector<1x1x8x32xf32>
    %37 = vector.shape_cast %36 : vector<1x1x8x32xf32> to vector<8x32xf32>
    %38 = vector.shape_cast %32 : vector<8x32xf32> to vector<1x1x8x32xf32>
    tpu.vector_store %arg5[%c0_16, %35, %c0_17, %c0_18], %38 {strides = array<i32>} : memref<1x2x8x128xf32, #tpu.memory_space<vmem>>, vector<1x1x8x32xf32>,
    %c4_i32_19 = arith.constant 4 : i32
    %39 = arith.muli %c0_i32_2, %c4_i32_19 : i32
    %c1_i32 = arith.constant 1 : i32
    %40 = arith.addi %39, %c1_i32 : i32
    %c0_20 = arith.constant 0 : index
    %c0_21 = arith.constant 0 : index
    %41 = vector.load %arg6[%c0_20, %c0_21] : memref<8x32xf32, #tpu.memory_space<vmem>>, vector<8x32xf32>
    %c0_22 = arith.constant 0 : index
    %42 = arith.index_cast %40 : i32 to index
    %c0_23 = arith.constant 0 : index
    %c0_24 = arith.constant 0 : index
    %43 = vector.load %arg3[%c0_22, %42, %c0_23, %c0_24] : memref<1x8x8x128xbf16, #tpu.memory_space<vmem>>, vector<1x1x8x128xbf16>
    %44 = vector.shape_cast %43 : vector<1x1x8x128xbf16> to vector<8x128xbf16>
    %45 = arith.extf %44 : vector<8x128xbf16> to vector<8x128xf32>
    %46 = arith.truncf %41 : vector<8x32xf32> to vector<8x32xbf16>
    %cst_25 = arith.constant dense<0.000000e+00> : vector<8x128xf32>
    %47 = tpu.matmul %46, %5, %cst_25 {dimension_numbers = #tpu.dot_dimension_numbers<[1], [0], [0], [1], [0, 0, 1, 1], [], []>} : vector<8x32xbf16>, vector<32x128xbf16>, vector<8x128xf32> -> vector<8x128xf32>
    %48 = arith.addf %45, %47 : vector<8x128xf32>
    %49 = vector.extract_strided_slice %48 {offsets = [0, 0], sizes = [8, 96], strides = [1, 1]} : vector<8x128xf32> to vector<8x96xf32>
    %50 = arith.negf %49 : vector<8x96xf32>
    %51 = math.exp %50 : vector<8x96xf32>
    %cst_26 = arith.constant 1.000000e+00 : f32
    %52 = vector.broadcast %cst_26 : f32 to vector<8x96xf32>
    %53 = arith.addf %52, %51 : vector<8x96xf32>
    %54 = arith.divf %52, %53 : vector<8x96xf32>
    %55 = vector.extract_strided_slice %54 {offsets = [0, 0], sizes = [8, 32], strides = [1, 1]} : vector<8x96xf32> to vector<8x32xf32>
    %56 = vector.extract_strided_slice %54 {offsets = [0, 32], sizes = [8, 32], strides = [1, 1]} : vector<8x96xf32> to vector<8x32xf32>
    %57 = vector.extract_strided_slice %54 {offsets = [0, 64], sizes = [8, 32], strides = [1, 1]} : vector<8x96xf32> to vector<8x32xf32>
    %58 = vector.extract_strided_slice %48 {offsets = [0, 96], sizes = [8, 32], strides = [1, 1]} : vector<8x128xf32> to vector<8x32xf32>
    %59 = math.tanh %58 : vector<8x32xf32>
    %c0_27 = arith.constant 0 : index
    %c0_28 = arith.constant 0 : index
    %60 = vector.load %arg7[%c0_27, %c0_28] : memref<8x32xf32, #tpu.memory_space<vmem>>, vector<8x32xf32>
    %61 = arith.mulf %56, %60 : vector<8x32xf32>
    %62 = arith.mulf %55, %59 : vector<8x32xf32>
    %63 = arith.addf %61, %62 : vector<8x32xf32>
    %64 = math.tanh %63 : vector<8x32xf32>
    %65 = arith.mulf %57, %64 : vector<8x32xf32>
    %c0_29 = arith.constant 0 : index
    %c0_30 = arith.constant 0 : index
    %66 = vector.load %arg7[%c0_29, %c0_30] : memref<8x32xf32, #tpu.memory_space<vmem>>, vector<8x32xf32>
    tpu.vector_store %arg7[%c0_29, %c0_30], %63 {strides = array<i32>} : memref<8x32xf32, #tpu.memory_space<vmem>>, vector<8x32xf32>,
    %c0_31 = arith.constant 0 : index
    %c0_32 = arith.constant 0 : index
    %67 = vector.load %arg6[%c0_31, %c0_32] : memref<8x32xf32, #tpu.memory_space<vmem>>, vector<8x32xf32>
    tpu.vector_store %arg6[%c0_31, %c0_32], %65 {strides = array<i32>} : memref<8x32xf32, #tpu.memory_space<vmem>>, vector<8x32xf32>,
    %c0_33 = arith.constant 0 : index
    %68 = arith.index_cast %c0_i32_2 : i32 to index
    %c0_34 = arith.constant 0 : index
    %c32 = arith.constant 32 : index
    %69 = vector.load %arg5[%c0_33, %68, %c0_34, %c32] : memref<1x2x8x128xf32, #tpu.memory_space<vmem>>, vector<1x1x8x32xf32>
    %70 = vector.shape_cast %69 : vector<1x1x8x32xf32> to vector<8x32xf32>
    %71 = vector.shape_cast %65 : vector<8x32xf32> to vector<1x1x8x32xf32>
    tpu.vector_store %arg5[%c0_33, %68, %c0_34, %c32], %71 {strides = array<i32>} : memref<1x2x8x128xf32, #tpu.memory_space<vmem>>, vector<1x1x8x32xf32>,
    %c4_i32_35 = arith.constant 4 : i32
    %72 = arith.muli %c0_i32_2, %c4_i32_35 : i32
    %c2_i32 = arith.constant 2 : i32
    %73 = arith.addi %72, %c2_i32 : i32
    %c0_36 = arith.constant 0 : index
    %c0_37 = arith.constant 0 : index
    %74 = vector.load %arg6[%c0_36, %c0_37] : memref<8x32xf32, #tpu.memory_space<vmem>>, vector<8x32xf32>
    %c0_38 = arith.constant 0 : index
    %75 = arith.index_cast %73 : i32 to index
    %c0_39 = arith.constant 0 : index
    %c0_40 = arith.constant 0 : index
    %76 = vector.load %arg3[%c0_38, %75, %c0_39, %c0_40] : memref<1x8x8x128xbf16, #tpu.memory_space<vmem>>, vector<1x1x8x128xbf16>
    %77 = vector.shape_cast %76 : vector<1x1x8x128xbf16> to vector<8x128xbf16>
    %78 = arith.extf %77 : vector<8x128xbf16> to vector<8x128xf32>
    %79 = arith.truncf %74 : vector<8x32xf32> to vector<8x32xbf16>
    %cst_41 = arith.constant dense<0.000000e+00> : vector<8x128xf32>
    %80 = tpu.matmul %79, %5, %cst_41 {dimension_numbers = #tpu.dot_dimension_numbers<[1], [0], [0], [1], [0, 0, 1, 1], [], []>} : vector<8x32xbf16>, vector<32x128xbf16>, vector<8x128xf32> -> vector<8x128xf32>
    %81 = arith.addf %78, %80 : vector<8x128xf32>
    %82 = vector.extract_strided_slice %81 {offsets = [0, 0], sizes = [8, 96], strides = [1, 1]} : vector<8x128xf32> to vector<8x96xf32>
    %83 = arith.negf %82 : vector<8x96xf32>
    %84 = math.exp %83 : vector<8x96xf32>
    %cst_42 = arith.constant 1.000000e+00 : f32
    %85 = vector.broadcast %cst_42 : f32 to vector<8x96xf32>
    %86 = arith.addf %85, %84 : vector<8x96xf32>
    %87 = arith.divf %85, %86 : vector<8x96xf32>
    %88 = vector.extract_strided_slice %87 {offsets = [0, 0], sizes = [8, 32], strides = [1, 1]} : vector<8x96xf32> to vector<8x32xf32>
    %89 = vector.extract_strided_slice %87 {offsets = [0, 32], sizes = [8, 32], strides = [1, 1]} : vector<8x96xf32> to vector<8x32xf32>
    %90 = vector.extract_strided_slice %87 {offsets = [0, 64], sizes = [8, 32], strides = [1, 1]} : vector<8x96xf32> to vector<8x32xf32>
    %91 = vector.extract_strided_slice %81 {offsets = [0, 96], sizes = [8, 32], strides = [1, 1]} : vector<8x128xf32> to vector<8x32xf32>
    %92 = math.tanh %91 : vector<8x32xf32>
    %c0_43 = arith.constant 0 : index
    %c0_44 = arith.constant 0 : index
    %93 = vector.load %arg7[%c0_43, %c0_44] : memref<8x32xf32, #tpu.memory_space<vmem>>, vector<8x32xf32>
    %94 = arith.mulf %89, %93 : vector<8x32xf32>
    %95 = arith.mulf %88, %92 : vector<8x32xf32>
    %96 = arith.addf %94, %95 : vector<8x32xf32>
    %97 = math.tanh %96 : vector<8x32xf32>
    %98 = arith.mulf %90, %97 : vector<8x32xf32>
    %c0_45 = arith.constant 0 : index
    %c0_46 = arith.constant 0 : index
    %99 = vector.load %arg7[%c0_45, %c0_46] : memref<8x32xf32, #tpu.memory_space<vmem>>, vector<8x32xf32>
    tpu.vector_store %arg7[%c0_45, %c0_46], %96 {strides = array<i32>} : memref<8x32xf32, #tpu.memory_space<vmem>>, vector<8x32xf32>,
    %c0_47 = arith.constant 0 : index
    %c0_48 = arith.constant 0 : index
    %100 = vector.load %arg6[%c0_47, %c0_48] : memref<8x32xf32, #tpu.memory_space<vmem>>, vector<8x32xf32>
    tpu.vector_store %arg6[%c0_47, %c0_48], %98 {strides = array<i32>} : memref<8x32xf32, #tpu.memory_space<vmem>>, vector<8x32xf32>,
    %c0_49 = arith.constant 0 : index
    %101 = arith.index_cast %c0_i32_2 : i32 to index
    %c0_50 = arith.constant 0 : index
    %c64 = arith.constant 64 : index
    %102 = vector.load %arg5[%c0_49, %101, %c0_50, %c64] : memref<1x2x8x128xf32, #tpu.memory_space<vmem>>, vector<1x1x8x32xf32>
    %103 = vector.shape_cast %102 : vector<1x1x8x32xf32> to vector<8x32xf32>
    %104 = vector.shape_cast %98 : vector<8x32xf32> to vector<1x1x8x32xf32>
    tpu.vector_store %arg5[%c0_49, %101, %c0_50, %c64], %104 {strides = array<i32>} : memref<1x2x8x128xf32, #tpu.memory_space<vmem>>, vector<1x1x8x32xf32>,
    %c4_i32_51 = arith.constant 4 : i32
    %105 = arith.muli %c0_i32_2, %c4_i32_51 : i32
    %c3_i32 = arith.constant 3 : i32
    %106 = arith.addi %105, %c3_i32 : i32
    %c0_52 = arith.constant 0 : index
    %c0_53 = arith.constant 0 : index
    %107 = vector.load %arg6[%c0_52, %c0_53] : memref<8x32xf32, #tpu.memory_space<vmem>>, vector<8x32xf32>
    %c0_54 = arith.constant 0 : index
    %108 = arith.index_cast %106 : i32 to index
    %c0_55 = arith.constant 0 : index
    %c0_56 = arith.constant 0 : index
    %109 = vector.load %arg3[%c0_54, %108, %c0_55, %c0_56] : memref<1x8x8x128xbf16, #tpu.memory_space<vmem>>, vector<1x1x8x128xbf16>
    %110 = vector.shape_cast %109 : vector<1x1x8x128xbf16> to vector<8x128xbf16>
    %111 = arith.extf %110 : vector<8x128xbf16> to vector<8x128xf32>
    %112 = arith.truncf %107 : vector<8x32xf32> to vector<8x32xbf16>
    %cst_57 = arith.constant dense<0.000000e+00> : vector<8x128xf32>
    %113 = tpu.matmul %112, %5, %cst_57 {dimension_numbers = #tpu.dot_dimension_numbers<[1], [0], [0], [1], [0, 0, 1, 1], [], []>} : vector<8x32xbf16>, vector<32x128xbf16>, vector<8x128xf32> -> vector<8x128xf32>
    %114 = arith.addf %111, %113 : vector<8x128xf32>
    %115 = vector.extract_strided_slice %114 {offsets = [0, 0], sizes = [8, 96], strides = [1, 1]} : vector<8x128xf32> to vector<8x96xf32>
    %116 = arith.negf %115 : vector<8x96xf32>
    %117 = math.exp %116 : vector<8x96xf32>
    %cst_58 = arith.constant 1.000000e+00 : f32
    %118 = vector.broadcast %cst_58 : f32 to vector<8x96xf32>
    %119 = arith.addf %118, %117 : vector<8x96xf32>
    %120 = arith.divf %118, %119 : vector<8x96xf32>
    %121 = vector.extract_strided_slice %120 {offsets = [0, 0], sizes = [8, 32], strides = [1, 1]} : vector<8x96xf32> to vector<8x32xf32>
    %122 = vector.extract_strided_slice %120 {offsets = [0, 32], sizes = [8, 32], strides = [1, 1]} : vector<8x96xf32> to vector<8x32xf32>
    %123 = vector.extract_strided_slice %120 {offsets = [0, 64], sizes = [8, 32], strides = [1, 1]} : vector<8x96xf32> to vector<8x32xf32>
    %124 = vector.extract_strided_slice %114 {offsets = [0, 96], sizes = [8, 32], strides = [1, 1]} : vector<8x128xf32> to vector<8x32xf32>
    %125 = math.tanh %124 : vector<8x32xf32>
    %c0_59 = arith.constant 0 : index
    %c0_60 = arith.constant 0 : index
    %126 = vector.load %arg7[%c0_59, %c0_60] : memref<8x32xf32, #tpu.memory_space<vmem>>, vector<8x32xf32>
    %127 = arith.mulf %122, %126 : vector<8x32xf32>
    %128 = arith.mulf %121, %125 : vector<8x32xf32>
    %129 = arith.addf %127, %128 : vector<8x32xf32>
    %130 = math.tanh %129 : vector<8x32xf32>
    %131 = arith.mulf %123, %130 : vector<8x32xf32>
    %c0_61 = arith.constant 0 : index
    %c0_62 = arith.constant 0 : index
    %132 = vector.load %arg7[%c0_61, %c0_62] : memref<8x32xf32, #tpu.memory_space<vmem>>, vector<8x32xf32>
    tpu.vector_store %arg7[%c0_61, %c0_62], %129 {strides = array<i32>} : memref<8x32xf32, #tpu.memory_space<vmem>>, vector<8x32xf32>,
    %c0_63 = arith.constant 0 : index
    %c0_64 = arith.constant 0 : index
    %133 = vector.load %arg6[%c0_63, %c0_64] : memref<8x32xf32, #tpu.memory_space<vmem>>, vector<8x32xf32>
    tpu.vector_store %arg6[%c0_63, %c0_64], %131 {strides = array<i32>} : memref<8x32xf32, #tpu.memory_space<vmem>>, vector<8x32xf32>,
    %c0_65 = arith.constant 0 : index
    %134 = arith.index_cast %c0_i32_2 : i32 to index
    %c0_66 = arith.constant 0 : index
    %c96 = arith.constant 96 : index
    %135 = vector.load %arg5[%c0_65, %134, %c0_66, %c96] : memref<1x2x8x128xf32, #tpu.memory_space<vmem>>, vector<1x1x8x32xf32>
    %136 = vector.shape_cast %135 : vector<1x1x8x32xf32> to vector<8x32xf32>
    %137 = vector.shape_cast %131 : vector<8x32xf32> to vector<1x1x8x32xf32>
    tpu.vector_store %arg5[%c0_65, %134, %c0_66, %c96], %137 {strides = array<i32>} : memref<1x2x8x128xf32, #tpu.memory_space<vmem>>, vector<1x1x8x32xf32>,
    %c1_i32_67 = arith.constant 1 : i32
    %c4_i32_68 = arith.constant 4 : i32
    %138 = arith.muli %c1_i32_67, %c4_i32_68 : i32
    %c0_i32_69 = arith.constant 0 : i32
    %139 = arith.addi %138, %c0_i32_69 : i32
    %c0_70 = arith.constant 0 : index
    %c0_71 = arith.constant 0 : index
    %140 = vector.load %arg6[%c0_70, %c0_71] : memref<8x32xf32, #tpu.memory_space<vmem>>, vector<8x32xf32>
    %c0_72 = arith.constant 0 : index
    %141 = arith.index_cast %139 : i32 to index
    %c0_73 = arith.constant 0 : index
    %c0_74 = arith.constant 0 : index
    %142 = vector.load %arg3[%c0_72, %141, %c0_73, %c0_74] : memref<1x8x8x128xbf16, #tpu.memory_space<vmem>>, vector<1x1x8x128xbf16>
    %143 = vector.shape_cast %142 : vector<1x1x8x128xbf16> to vector<8x128xbf16>
    %144 = arith.extf %143 : vector<8x128xbf16> to vector<8x128xf32>
    %145 = arith.truncf %140 : vector<8x32xf32> to vector<8x32xbf16>
    %cst_75 = arith.constant dense<0.000000e+00> : vector<8x128xf32>
    %146 = tpu.matmul %145, %5, %cst_75 {dimension_numbers = #tpu.dot_dimension_numbers<[1], [0], [0], [1], [0, 0, 1, 1], [], []>} : vector<8x32xbf16>, vector<32x128xbf16>, vector<8x128xf32> -> vector<8x128xf32>
    %147 = arith.addf %144, %146 : vector<8x128xf32>
    %148 = vector.extract_strided_slice %147 {offsets = [0, 0], sizes = [8, 96], strides = [1, 1]} : vector<8x128xf32> to vector<8x96xf32>
    %149 = arith.negf %148 : vector<8x96xf32>
    %150 = math.exp %149 : vector<8x96xf32>
    %cst_76 = arith.constant 1.000000e+00 : f32
    %151 = vector.broadcast %cst_76 : f32 to vector<8x96xf32>
    %152 = arith.addf %151, %150 : vector<8x96xf32>
    %153 = arith.divf %151, %152 : vector<8x96xf32>
    %154 = vector.extract_strided_slice %153 {offsets = [0, 0], sizes = [8, 32], strides = [1, 1]} : vector<8x96xf32> to vector<8x32xf32>
    %155 = vector.extract_strided_slice %153 {offsets = [0, 32], sizes = [8, 32], strides = [1, 1]} : vector<8x96xf32> to vector<8x32xf32>
    %156 = vector.extract_strided_slice %153 {offsets = [0, 64], sizes = [8, 32], strides = [1, 1]} : vector<8x96xf32> to vector<8x32xf32>
    %157 = vector.extract_strided_slice %147 {offsets = [0, 96], sizes = [8, 32], strides = [1, 1]} : vector<8x128xf32> to vector<8x32xf32>
    %158 = math.tanh %157 : vector<8x32xf32>
    %c0_77 = arith.constant 0 : index
    %c0_78 = arith.constant 0 : index
    %159 = vector.load %arg7[%c0_77, %c0_78] : memref<8x32xf32, #tpu.memory_space<vmem>>, vector<8x32xf32>
    %160 = arith.mulf %155, %159 : vector<8x32xf32>
    %161 = arith.mulf %154, %158 : vector<8x32xf32>
    %162 = arith.addf %160, %161 : vector<8x32xf32>
    %163 = math.tanh %162 : vector<8x32xf32>
    %164 = arith.mulf %156, %163 : vector<8x32xf32>
    %c0_79 = arith.constant 0 : index
    %c0_80 = arith.constant 0 : index
    %165 = vector.load %arg7[%c0_79, %c0_80] : memref<8x32xf32, #tpu.memory_space<vmem>>, vector<8x32xf32>
    tpu.vector_store %arg7[%c0_79, %c0_80], %162 {strides = array<i32>} : memref<8x32xf32, #tpu.memory_space<vmem>>, vector<8x32xf32>,
    %c0_81 = arith.constant 0 : index
    %c0_82 = arith.constant 0 : index
    %166 = vector.load %arg6[%c0_81, %c0_82] : memref<8x32xf32, #tpu.memory_space<vmem>>, vector<8x32xf32>
    tpu.vector_store %arg6[%c0_81, %c0_82], %164 {strides = array<i32>} : memref<8x32xf32, #tpu.memory_space<vmem>>, vector<8x32xf32>,
    %c0_83 = arith.constant 0 : index
    %167 = arith.index_cast %c1_i32_67 : i32 to index
    %c0_84 = arith.constant 0 : index
    %c0_85 = arith.constant 0 : index
    %168 = vector.load %arg5[%c0_83, %167, %c0_84, %c0_85] : memref<1x2x8x128xf32, #tpu.memory_space<vmem>>, vector<1x1x8x32xf32>
    %169 = vector.shape_cast %168 : vector<1x1x8x32xf32> to vector<8x32xf32>
    %170 = vector.shape_cast %164 : vector<8x32xf32> to vector<1x1x8x32xf32>
    tpu.vector_store %arg5[%c0_83, %167, %c0_84, %c0_85], %170 {strides = array<i32>} : memref<1x2x8x128xf32, #tpu.memory_space<vmem>>, vector<1x1x8x32xf32>,
    %c4_i32_86 = arith.constant 4 : i32
    %171 = arith.muli %c1_i32_67, %c4_i32_86 : i32
    %c1_i32_87 = arith.constant 1 : i32
    %172 = arith.addi %171, %c1_i32_87 : i32
    %c0_88 = arith.constant 0 : index
    %c0_89 = arith.constant 0 : index
    %173 = vector.load %arg6[%c0_88, %c0_89] : memref<8x32xf32, #tpu.memory_space<vmem>>, vector<8x32xf32>
    %c0_90 = arith.constant 0 : index
    %174 = arith.index_cast %172 : i32 to index
    %c0_91 = arith.constant 0 : index
    %c0_92 = arith.constant 0 : index
    %175 = vector.load %arg3[%c0_90, %174, %c0_91, %c0_92] : memref<1x8x8x128xbf16, #tpu.memory_space<vmem>>, vector<1x1x8x128xbf16>
    %176 = vector.shape_cast %175 : vector<1x1x8x128xbf16> to vector<8x128xbf16>
    %177 = arith.extf %176 : vector<8x128xbf16> to vector<8x128xf32>
    %178 = arith.truncf %173 : vector<8x32xf32> to vector<8x32xbf16>
    %cst_93 = arith.constant dense<0.000000e+00> : vector<8x128xf32>
    %179 = tpu.matmul %178, %5, %cst_93 {dimension_numbers = #tpu.dot_dimension_numbers<[1], [0], [0], [1], [0, 0, 1, 1], [], []>} : vector<8x32xbf16>, vector<32x128xbf16>, vector<8x128xf32> -> vector<8x128xf32>
    %180 = arith.addf %177, %179 : vector<8x128xf32>
    %181 = vector.extract_strided_slice %180 {offsets = [0, 0], sizes = [8, 96], strides = [1, 1]} : vector<8x128xf32> to vector<8x96xf32>
    %182 = arith.negf %181 : vector<8x96xf32>
    %183 = math.exp %182 : vector<8x96xf32>
    %cst_94 = arith.constant 1.000000e+00 : f32
    %184 = vector.broadcast %cst_94 : f32 to vector<8x96xf32>
    %185 = arith.addf %184, %183 : vector<8x96xf32>
    %186 = arith.divf %184, %185 : vector<8x96xf32>
    %187 = vector.extract_strided_slice %186 {offsets = [0, 0], sizes = [8, 32], strides = [1, 1]} : vector<8x96xf32> to vector<8x32xf32>
    %188 = vector.extract_strided_slice %186 {offsets = [0, 32], sizes = [8, 32], strides = [1, 1]} : vector<8x96xf32> to vector<8x32xf32>
    %189 = vector.extract_strided_slice %186 {offsets = [0, 64], sizes = [8, 32], strides = [1, 1]} : vector<8x96xf32> to vector<8x32xf32>
    %190 = vector.extract_strided_slice %180 {offsets = [0, 96], sizes = [8, 32], strides = [1, 1]} : vector<8x128xf32> to vector<8x32xf32>
    %191 = math.tanh %190 : vector<8x32xf32>
    %c0_95 = arith.constant 0 : index
    %c0_96 = arith.constant 0 : index
    %192 = vector.load %arg7[%c0_95, %c0_96] : memref<8x32xf32, #tpu.memory_space<vmem>>, vector<8x32xf32>
    %193 = arith.mulf %188, %192 : vector<8x32xf32>
    %194 = arith.mulf %187, %191 : vector<8x32xf32>
    %195 = arith.addf %193, %194 : vector<8x32xf32>
    %196 = math.tanh %195 : vector<8x32xf32>
    %197 = arith.mulf %189, %196 : vector<8x32xf32>
    %c0_97 = arith.constant 0 : index
    %c0_98 = arith.constant 0 : index
    %198 = vector.load %arg7[%c0_97, %c0_98] : memref<8x32xf32, #tpu.memory_space<vmem>>, vector<8x32xf32>
    tpu.vector_store %arg7[%c0_97, %c0_98], %195 {strides = array<i32>} : memref<8x32xf32, #tpu.memory_space<vmem>>, vector<8x32xf32>,
    %c0_99 = arith.constant 0 : index
    %c0_100 = arith.constant 0 : index
    %199 = vector.load %arg6[%c0_99, %c0_100] : memref<8x32xf32, #tpu.memory_space<vmem>>, vector<8x32xf32>
    tpu.vector_store %arg6[%c0_99, %c0_100], %197 {strides = array<i32>} : memref<8x32xf32, #tpu.memory_space<vmem>>, vector<8x32xf32>,
    %c0_101 = arith.constant 0 : index
    %200 = arith.index_cast %c1_i32_67 : i32 to index
    %c0_102 = arith.constant 0 : index
    %c32_103 = arith.constant 32 : index
    %201 = vector.load %arg5[%c0_101, %200, %c0_102, %c32_103] : memref<1x2x8x128xf32, #tpu.memory_space<vmem>>, vector<1x1x8x32xf32>
    %202 = vector.shape_cast %201 : vector<1x1x8x32xf32> to vector<8x32xf32>
    %203 = vector.shape_cast %197 : vector<8x32xf32> to vector<1x1x8x32xf32>
    tpu.vector_store %arg5[%c0_101, %200, %c0_102, %c32_103], %203 {strides = array<i32>} : memref<1x2x8x128xf32, #tpu.memory_space<vmem>>, vector<1x1x8x32xf32>,
    %c4_i32_104 = arith.constant 4 : i32
    %204 = arith.muli %c1_i32_67, %c4_i32_104 : i32
    %c2_i32_105 = arith.constant 2 : i32
    %205 = arith.addi %204, %c2_i32_105 : i32
    %c0_106 = arith.constant 0 : index
    %c0_107 = arith.constant 0 : index
    %206 = vector.load %arg6[%c0_106, %c0_107] : memref<8x32xf32, #tpu.memory_space<vmem>>, vector<8x32xf32>
    %c0_108 = arith.constant 0 : index
    %207 = arith.index_cast %205 : i32 to index
    %c0_109 = arith.constant 0 : index
    %c0_110 = arith.constant 0 : index
    %208 = vector.load %arg3[%c0_108, %207, %c0_109, %c0_110] : memref<1x8x8x128xbf16, #tpu.memory_space<vmem>>, vector<1x1x8x128xbf16>
    %209 = vector.shape_cast %208 : vector<1x1x8x128xbf16> to vector<8x128xbf16>
    %210 = arith.extf %209 : vector<8x128xbf16> to vector<8x128xf32>
    %211 = arith.truncf %206 : vector<8x32xf32> to vector<8x32xbf16>
    %cst_111 = arith.constant dense<0.000000e+00> : vector<8x128xf32>
    %212 = tpu.matmul %211, %5, %cst_111 {dimension_numbers = #tpu.dot_dimension_numbers<[1], [0], [0], [1], [0, 0, 1, 1], [], []>} : vector<8x32xbf16>, vector<32x128xbf16>, vector<8x128xf32> -> vector<8x128xf32>
    %213 = arith.addf %210, %212 : vector<8x128xf32>
    %214 = vector.extract_strided_slice %213 {offsets = [0, 0], sizes = [8, 96], strides = [1, 1]} : vector<8x128xf32> to vector<8x96xf32>
    %215 = arith.negf %214 : vector<8x96xf32>
    %216 = math.exp %215 : vector<8x96xf32>
    %cst_112 = arith.constant 1.000000e+00 : f32
    %217 = vector.broadcast %cst_112 : f32 to vector<8x96xf32>
    %218 = arith.addf %217, %216 : vector<8x96xf32>
    %219 = arith.divf %217, %218 : vector<8x96xf32>
    %220 = vector.extract_strided_slice %219 {offsets = [0, 0], sizes = [8, 32], strides = [1, 1]} : vector<8x96xf32> to vector<8x32xf32>
    %221 = vector.extract_strided_slice %219 {offsets = [0, 32], sizes = [8, 32], strides = [1, 1]} : vector<8x96xf32> to vector<8x32xf32>
    %222 = vector.extract_strided_slice %219 {offsets = [0, 64], sizes = [8, 32], strides = [1, 1]} : vector<8x96xf32> to vector<8x32xf32>
    %223 = vector.extract_strided_slice %213 {offsets = [0, 96], sizes = [8, 32], strides = [1, 1]} : vector<8x128xf32> to vector<8x32xf32>
    %224 = math.tanh %223 : vector<8x32xf32>
    %c0_113 = arith.constant 0 : index
    %c0_114 = arith.constant 0 : index
    %225 = vector.load %arg7[%c0_113, %c0_114] : memref<8x32xf32, #tpu.memory_space<vmem>>, vector<8x32xf32>
    %226 = arith.mulf %221, %225 : vector<8x32xf32>
    %227 = arith.mulf %220, %224 : vector<8x32xf32>
    %228 = arith.addf %226, %227 : vector<8x32xf32>
    %229 = math.tanh %228 : vector<8x32xf32>
    %230 = arith.mulf %222, %229 : vector<8x32xf32>
    %c0_115 = arith.constant 0 : index
    %c0_116 = arith.constant 0 : index
    %231 = vector.load %arg7[%c0_115, %c0_116] : memref<8x32xf32, #tpu.memory_space<vmem>>, vector<8x32xf32>
    tpu.vector_store %arg7[%c0_115, %c0_116], %228 {strides = array<i32>} : memref<8x32xf32, #tpu.memory_space<vmem>>, vector<8x32xf32>,
    %c0_117 = arith.constant 0 : index
    %c0_118 = arith.constant 0 : index
    %232 = vector.load %arg6[%c0_117, %c0_118] : memref<8x32xf32, #tpu.memory_space<vmem>>, vector<8x32xf32>
    tpu.vector_store %arg6[%c0_117, %c0_118], %230 {strides = array<i32>} : memref<8x32xf32, #tpu.memory_space<vmem>>, vector<8x32xf32>,
    %c0_119 = arith.constant 0 : index
    %233 = arith.index_cast %c1_i32_67 : i32 to index
    %c0_120 = arith.constant 0 : index
    %c64_121 = arith.constant 64 : index
    %234 = vector.load %arg5[%c0_119, %233, %c0_120, %c64_121] : memref<1x2x8x128xf32, #tpu.memory_space<vmem>>, vector<1x1x8x32xf32>
    %235 = vector.shape_cast %234 : vector<1x1x8x32xf32> to vector<8x32xf32>
    %236 = vector.shape_cast %230 : vector<8x32xf32> to vector<1x1x8x32xf32>
    tpu.vector_store %arg5[%c0_119, %233, %c0_120, %c64_121], %236 {strides = array<i32>} : memref<1x2x8x128xf32, #tpu.memory_space<vmem>>, vector<1x1x8x32xf32>,
    %c4_i32_122 = arith.constant 4 : i32
    %237 = arith.muli %c1_i32_67, %c4_i32_122 : i32
    %c3_i32_123 = arith.constant 3 : i32
    %238 = arith.addi %237, %c3_i32_123 : i32
    %c0_124 = arith.constant 0 : index
    %c0_125 = arith.constant 0 : index
    %239 = vector.load %arg6[%c0_124, %c0_125] : memref<8x32xf32, #tpu.memory_space<vmem>>, vector<8x32xf32>
    %c0_126 = arith.constant 0 : index
    %240 = arith.index_cast %238 : i32 to index
    %c0_127 = arith.constant 0 : index
    %c0_128 = arith.constant 0 : index
    %241 = vector.load %arg3[%c0_126, %240, %c0_127, %c0_128] : memref<1x8x8x128xbf16, #tpu.memory_space<vmem>>, vector<1x1x8x128xbf16>
    %242 = vector.shape_cast %241 : vector<1x1x8x128xbf16> to vector<8x128xbf16>
    %243 = arith.extf %242 : vector<8x128xbf16> to vector<8x128xf32>
    %244 = arith.truncf %239 : vector<8x32xf32> to vector<8x32xbf16>
    %cst_129 = arith.constant dense<0.000000e+00> : vector<8x128xf32>
    %245 = tpu.matmul %244, %5, %cst_129 {dimension_numbers = #tpu.dot_dimension_numbers<[1], [0], [0], [1], [0, 0, 1, 1], [], []>} : vector<8x32xbf16>, vector<32x128xbf16>, vector<8x128xf32> -> vector<8x128xf32>
    %246 = arith.addf %243, %245 : vector<8x128xf32>
    %247 = vector.extract_strided_slice %246 {offsets = [0, 0], sizes = [8, 96], strides = [1, 1]} : vector<8x128xf32> to vector<8x96xf32>
    %248 = arith.negf %247 : vector<8x96xf32>
    %249 = math.exp %248 : vector<8x96xf32>
    %cst_130 = arith.constant 1.000000e+00 : f32
    %250 = vector.broadcast %cst_130 : f32 to vector<8x96xf32>
    %251 = arith.addf %250, %249 : vector<8x96xf32>
    %252 = arith.divf %250, %251 : vector<8x96xf32>
    %253 = vector.extract_strided_slice %252 {offsets = [0, 0], sizes = [8, 32], strides = [1, 1]} : vector<8x96xf32> to vector<8x32xf32>
    %254 = vector.extract_strided_slice %252 {offsets = [0, 32], sizes = [8, 32], strides = [1, 1]} : vector<8x96xf32> to vector<8x32xf32>
    %255 = vector.extract_strided_slice %252 {offsets = [0, 64], sizes = [8, 32], strides = [1, 1]} : vector<8x96xf32> to vector<8x32xf32>
    %256 = vector.extract_strided_slice %246 {offsets = [0, 96], sizes = [8, 32], strides = [1, 1]} : vector<8x128xf32> to vector<8x32xf32>
    %257 = math.tanh %256 : vector<8x32xf32>
    %c0_131 = arith.constant 0 : index
    %c0_132 = arith.constant 0 : index
    %258 = vector.load %arg7[%c0_131, %c0_132] : memref<8x32xf32, #tpu.memory_space<vmem>>, vector<8x32xf32>
    %259 = arith.mulf %254, %258 : vector<8x32xf32>
    %260 = arith.mulf %253, %257 : vector<8x32xf32>
    %261 = arith.addf %259, %260 : vector<8x32xf32>
    %262 = math.tanh %261 : vector<8x32xf32>
    %263 = arith.mulf %255, %262 : vector<8x32xf32>
    %c0_133 = arith.constant 0 : index
    %c0_134 = arith.constant 0 : index
    %264 = vector.load %arg7[%c0_133, %c0_134] : memref<8x32xf32, #tpu.memory_space<vmem>>, vector<8x32xf32>
    tpu.vector_store %arg7[%c0_133, %c0_134], %261 {strides = array<i32>} : memref<8x32xf32, #tpu.memory_space<vmem>>, vector<8x32xf32>,
    %c0_135 = arith.constant 0 : index
    %c0_136 = arith.constant 0 : index
    %265 = vector.load %arg6[%c0_135, %c0_136] : memref<8x32xf32, #tpu.memory_space<vmem>>, vector<8x32xf32>
    tpu.vector_store %arg6[%c0_135, %c0_136], %263 {strides = array<i32>} : memref<8x32xf32, #tpu.memory_space<vmem>>, vector<8x32xf32>,
    %c0_137 = arith.constant 0 : index
    %266 = arith.index_cast %c1_i32_67 : i32 to index
    %c0_138 = arith.constant 0 : index
    %c96_139 = arith.constant 96 : index
    %267 = vector.load %arg5[%c0_137, %266, %c0_138, %c96_139] : memref<1x2x8x128xf32, #tpu.memory_space<vmem>>, vector<1x1x8x32xf32>
    %268 = vector.shape_cast %267 : vector<1x1x8x32xf32> to vector<8x32xf32>
    %269 = vector.shape_cast %263 : vector<8x32xf32> to vector<1x1x8x32xf32>
    tpu.vector_store %arg5[%c0_137, %266, %c0_138, %c96_139], %269 {strides = array<i32>} : memref<1x2x8x128xf32, #tpu.memory_space<vmem>>, vector<1x1x8x32xf32>,
    %c2_i32_140 = arith.constant 2 : i32
    return
  }
  func.func @transform_0(%arg0: i32, %arg1: i32, %arg2: i32) -> (i32, i32, i32, i32) {
    %c0_i32 = arith.constant 0 : i32
    %c0_i32_0 = arith.constant 0 : i32
    return %arg0, %arg2, %arg1, %c0_i32 : i32, i32, i32, i32
  }
  func.func @transform_1(%arg0: i32, %arg1: i32, %arg2: i32) -> (i32, i32, i32) {
    %c0_i32 = arith.constant 0 : i32
    %c0_i32_0 = arith.constant 0 : i32
    %c0_i32_1 = arith.constant 0 : i32
    %c0_i32_2 = arith.constant 0 : i32
    return %c0_i32, %c0_i32_0, %c0_i32_1 : i32, i32, i32
  }
  func.func @transform_2(%arg0: i32, %arg1: i32, %arg2: i32) -> (i32, i32, i32, i32) {
    %c0_i32 = arith.constant 0 : i32
    %c0_i32_0 = arith.constant 0 : i32
    return %arg0, %arg2, %arg1, %c0_i32 : i32, i32, i32, i32
  }
}

</mosaic_0001>

<bundles_post_ra>
// kernel: tpu_custom_call.1
= control target key start
LH: loop header
LB: loop body
LE: loop exit
PB: predicated region body
PF: predicated region fallthrough
CT: control target
= control target key end

     0   :  { %7 = vsyncpa [#allocation5], 0  ;;  %s1945_s0 = inlined_call_operand.hbm [shape: bf16[2,8,8,128], index: 0, kind: input, shape index: {}]   ;;  %s1946_s1 = inlined_call_operand.hbm [shape: bf16[2,32,128], index: 1, kind: input, shape index: {}]   ;;  %s1947_s2 = inlined_call_operand.hbm [shape: f32[2,2,8,128], index: 2, kind: output, shape index: {}]  }
   0x1   :  { %9 = vsyncpa [#allocation5 + $0x1], 0 }
   0x2   :  { %10 = vsyncpa [#allocation8], 0 }
   0x3   :  { %11 = vsyncpa [#allocation6], 0 }
   0x4   :  { %13 = vsyncpa [#allocation6 + $0x1], 0  ;;  %s1545_s9 = smov 0   ;;  %s1547_s10 = smov 0  }
   0x5   :  { %s1549_s11 = smov 0   ;;  %s1551_s12 = smov 0  }
   0x6   :  { %s1553_s13 = smov 0   ;;  %s1555_s14 = smov 0  }
   0x7 LB: > { %s1085_s15 = sadd.s32 4294967295, %s1516_s14   ;;  %s1086_s16 = sadd.s32 4294967294, %s1516_s14   ;;  %s1516_s14 = sphi %s1555_s14, %s19_s14   ;;  %s1512_s13 = sphi %s1553_s13, %s1971_s13   ;;  %s1508_s12 = sphi %s1551_s12, %s1970_s12   ;;  %s1504_s11 = sphi %s1549_s11, %s1969_s11   ;;  %s1500_s10 = sphi %s1547_s10, %s1968_s10   ;;  %s1496_s9 = sphi %s1545_s9, %s1967_s9  }
   0x8   : > { %p62_p0 = scmp.ne.s32.totalorder %s1500_s10, %s1496_s9  ;;  %p1579_p1 = scmp.eq.s32.totalorder %s1085_s15, 0 }
   0x9   : > { %p1583_p2 = scmp.eq.s32.totalorder %s1085_s15, 1  ;;  %p117_p3 = scmp.eq.s32.totalorder %s1086_s16, 1 }
   0xa   : > { %s1952_s17 = scalar_select %p1579_p1, 1, 0 }
   0xb   : > { %s1953_s18 = scalar_select %p1583_p2, 1, 0 }
   0xc   : > { %p1589_p4 = por %p1579_p1, %p62_p0  ;;  %p1087_p5 = scmp.ge.s32.totalorder %s1516_s14, 1 }
   0xd   : > { %p1594_p6 = por %p117_p3, %p62_p0  ;;  %p124_p7 = scmp.lt.s32.totalorder %s1516_s14, 3 }
   0xe   : > { %s1954_s19 = scalar_select %p1589_p4, 1, 0 }
   0xf   : > { %s1955_s20 = scalar_select %p1594_p6, 1, 0 }
  0x10   : > { %p1599_p8 = pnand %p1087_p5, %p124_p7  ;;  %s1518_s22 = smov [#allocation7]  }
  0x11   : > { %s136_s23 = sshll.u32 %s1518_s22, 4  ;;  %s38_s25 = sadd.s32 1, %s1512_s13  ;;  %s137_s23 = int_to_ptr.vmem [resolvable:$true] %s136_s23 }
  0x12   : > { %s1956_s21 = scalar_select %p1599_p8, 1, 0 }
  0x13   : > { %p1232_p9 = pneg %p1599_p8  ;;  %s1372_s28 = scalar_lea.hbm %s1946_s1, 512 }
  0x14   : > { %p1373_p12 = scmp.ne.s32.totalorder %s1946_s1, %s1372_s28  ;;  %p1379_p5 = scmp.lt.u32.totalorder %s1372_s28, %s1946_s1 }
  0x15   : > { %p1608_p11 = pnand %p1232_p9, %p1579_p1 }
  0x17   : > { %p1374_p13 = pneg %p1608_p11 }
  0x19   : > { %p1375_p0 = pnand %p1374_p13, %p1373_p12 }
  0x1b   : > { %p1376_p3 = pneg %p1375_p0 }
  0x1d   : > { %p1381_p7 = pnand %p1379_p5, %p1376_p3 }
  0x1f   : > { %1384 = shalt.err (!%p1381_p7)
}
  0x20   : > { %s1385_s5 = scalar_lea.vmem %s137_s23, 512  ;;  %p1393_p1 = scmp.lt.s32.totalorder %s137_s23, %s137_s23 }
  0x21   : > { %p1386_p9 = scmp.ne.s32.totalorder %s137_s23, %s1385_s5  ;;  %p1394_p4 = scmp.lt.s32.totalorder %s1385_s5, %s1385_s5 }
  0x23   : > { %p1388_p10 = pnand %p1386_p9, %p1374_p13  ;;  %p1395_p8 = por %p1394_p4, %p1393_p1 }
  0x25   : > { %p1389_p6 = pneg %p1388_p10 }
  0x27   : > { %p1396_p2 = pnand %p1395_p8, %p1389_p6 }
  0x29   : > { %1399 = shalt.err (!%p1396_p2)
}
  0x2a   : > { %s1519_s6 = smov 64   ;;  %s1520_s7 = smov 4  }
  0x2b   : > { %1235 = dma.hbm_to_vmem [thread:$0]  (!%p1608_p11), %s1946_s1, 512, %s137_s23, [#allocation8], %s1519_s6, %s1519_s6, %s1520_s7  }
  0x2c   : > { %p40_p1 = scmp.ge.s32.totalorder %s38_s25, 2  ;;  %s49_s16 = sadd.s32 1, %s1504_s11 }
  0x2d   : > { %p56_p2 = scmp.ne.s32.totalorder %s1504_s11, %s1500_s10  ;;  %p57_p4 = scmp.eq.s32.totalorder %s1516_s14, 0 }
  0x2e   : > { %s1973_s25 = smov (%p40_p1, %s38_s25), 0  ;;  %p1959_p8 = scmp.ne.s32.totalorder %s1953_s18, 0 }
  0x2f   : > { %p1638_p6 = por %p57_p4, %p56_p2  ;;  %s42_s26 = ssub.s32 %s1512_s13, %s1973_s25 }
  0x30   : > { %p1644_p10 = por %p1959_p8, %p56_p2  ;;  %p1245_p12 = scmp.lt.s32.totalorder %s1516_s14, 2 }
  0x31   : > { %p47_p11 = scmp.eq.s32.totalorder %s42_s26, 0  ;;  %s150_s23 = sand.u32 1, %s1504_s11  }
  0x32   : > { %s1090_s27 = sshll.u32 %s150_s23, 5  ;;  %s1133_s29 = sshll.u32 %s1512_s13, 9 }
  0x33   : > { %s1653_s28 = scalar_select %p47_p11, %s1504_s11, %s49_s16  }
  0x34   : > { %s1659_s4 = scalar_lea.hbm %s1945_s0, %s1133_s29  ;;  %s154_s18 = scalar_lea.vmem [#allocation4], %s1090_s27 }
  0x35   : > { %s164_s5 = sshll.u32 %s154_s18, 4  ;;  %p1665_p13 = pnand %p1245_p12, %p1638_p6  ;;  %s1661_s5 = int_to_ptr.vmem [resolvable:$true] %s164_s5 }
  0x36   : > { %s1669_s15 = scalar_lea.sflag [#allocation5], %s150_s23  ;;  %s1400_s16 = scalar_lea.hbm %s1659_s4, 512 }
  0x37   : > { %p1401_p0 = scmp.ne.s32.totalorder %s1659_s4, %s1400_s16  ;;  %p1402_p3 = pneg %p1665_p13 }
  0x38   : > { %s1405_s22 = scalar_lea.hbm %s1945_s0, 1024  ;;  %p1406_p9 = scmp.lt.u32.totalorder %s1659_s4, %s1945_s0 }
  0x39   : > { %p1403_p5 = pnand %p1402_p3, %p1401_p0  ;;  %p1407_p1 = scmp.lt.u32.totalorder %s1405_s22, %s1400_s16 }
  0x3a   : > { %p1409_p4 = scmp.lt.u32.totalorder %s1400_s16, %s1659_s4 }
  0x3b   : > { %p1404_p7 = pneg %p1403_p5  ;;  %p1408_p2 = por %p1407_p1, %p1406_p9 }
  0x3d   : > { %p1410_p6 = por %p1409_p4, %p1408_p2 }
  0x3f   : > { %p1411_p8 = pnand %p1410_p6, %p1404_p7 }
  0x41   : > { %1414 = shalt.err (!%p1411_p8)
}
  0x42   : > { %s1415_s23 = scalar_lea.vmem %s1661_s5, 512  ;;  %s1521_s3 = smov [#allocation4]  }
  0x43   : > { %p1416_p12 = scmp.ne.s32.totalorder %s1661_s5, %s1415_s23  ;;  %s1420_s18 = sshll.u32 %s1521_s3, 4  ;;  %s1421_s18 = int_to_ptr.vmem [resolvable:$false] %s1420_s18 }
  0x44   : > { %s1422_s26 = scalar_lea.vmem %s1421_s18, 1024  ;;  %p1423_p5 = scmp.lt.s32.totalorder %s1661_s5, %s1421_s18 }
  0x45   : > { %p1418_p11 = pnand %p1416_p12, %p1402_p3  ;;  %p1424_p9 = scmp.lt.s32.totalorder %s1422_s26, %s1415_s23 }
  0x47   : > { %p1419_p0 = pneg %p1418_p11  ;;  %p1425_p1 = por %p1424_p9, %p1423_p5 }
  0x49   : > { %p1426_p2 = pnand %p1425_p1, %p1419_p0 }
  0x4b   : > { %1429 = shalt.err (!%p1426_p2)
}
  0x4c   : > { %1239 = dma.hbm_to_vmem [thread:$0]  (!%p1665_p13), %s1659_s4, 512, %s1661_s5, %s1669_s15, %s1519_s6, %s1519_s6, %s1520_s7  }
  0x4d   : > { %p1962_p3 = scmp.ne.s32.totalorder %s1956_s21, 0 }
  0x4e   : > { %s1703_s16 = sand.u32 (!%p1962_p3), 1, %s1500_s10   ;;  %p1963_p7 = scmp.ne.s32.totalorder (!%p1962_p3), %s1954_s19, 0 }
  0x4f   : > { %176 = sbr.rel (%p1962_p3) target bundleno = 5802 (0x16aa), region = 28  ;;  %s1094_s27 = sshll.u32 (!%p1962_p3), %s1703_s16, 5 }
  0x50   : > { %s179_s22 = scalar_lea.sflag (!%p1962_p3), [#allocation5], %s1703_s16  ;;  %s1707_s29 = scalar_lea.vmem (!%p1962_p3), [#allocation4], %s1094_s27 }
  0x56   : > { %1483 = dma.done.wait (%p1963_p7), %s179_s22, 512  }
  0x57   : > { %1485 = vsyncadd (%p1963_p7), %s179_s22, 4294966784  ;;  %p1964_p13 = scmp.ne.s32.totalorder %s1952_s17, 0 }
  0x59   : > { %1487 = dma.done.wait (%p1964_p13), [#allocation8], 512  }
  0x5a   : > { %1489 = vsyncadd (%p1964_p13), [#allocation8], 4294966784  ;;  %vm214_vm0 = vcmask 261120   ;;  %v1522_v0 = vmov 0.0   ;;  %s1134_s21 = sshll.u32 %s1508_s12, 4  ;;  %vm1523_vm1 = vmmov 0  }
  0x5b   : > { %1160 = vmatprep.subr.bf16.mxu0 %v1522_v0  ;;  %1164 = vmatprep.mubr.msk.bf16.mxu0 %vm1523_vm1, %v1522_v0  ;;  %215 = vst.msk [vmem:[#allocation2] sm:$0xff] %vm214_vm0, %v1522_v0  ;;  %216 = vst.msk [vmem:[#allocation3] sm:$0xff] %vm214_vm0, %v1522_v0  ;;  %s219_s17 = scalar_lea.vmem [#allocation7], %s1134_s21  ;;  %v225_v5 = vld [vmem:[%s1707_s29] sm:$0xff]   ;;  %s1524_s19 = smov 32   ;;  %v1106_v57 = vld [vmem:[%s1707_s29 + $0x8] sm:$0xff]  }
  0x5c   : > { %1168 = vmatprep.subr.bf16.mxu1 %v1522_v0  ;;  %1172 = vmatprep.mubr.msk.bf16.mxu1 %vm1523_vm1, %v1522_v0  ;;  %v1728_v1 = vld [vmem:[%s219_s17] sm:$0xff]   ;;  %v1731_v2 = vld [vmem:[%s219_s17 + $0x8] sm:$0xff]   ;;  %v226_v6 = vunpack.c.l.bf16 %v225_v5  ;;  %s1525_s6 = smov 96   ;;  %s1526_s7 = smov 64   ;;  %v328_v32 = vunpack.c.h.bf16 %v225_v5  ;;  %v421_v58 = vunpack.c.l.bf16 %v1106_v57  ;;  %vm416_vm2 = vcmask 523520  }
  0x5d   : > { %1161 = vmatpush3.bf16.msra.mxu0 %v1728_v1  ;;  %1169 = vmatpush3.bf16.msra.mxu1 %v1728_v1  ;;  %s1096_s4 = sshll.u32 %s1703_s16, 4  ;;  %vm506_vm3 = vcmask 785920   ;;  %vm599_vm4 = vcmask 1048320   ;;  %s1135_s8 = sshll.u32 %s1508_s12, 8 }
  0x5e   : > { %1162 = vmatprep.subr.bf16.mxu0 %v1522_v0  ;;  %1170 = vmatprep.subr.bf16.mxu1 %v1522_v0  ;;  %s1758_s5 = scalar_lea.vmem [#allocation9], %s1096_s4  ;;  %s1891_s3 = scalar_lea.hbm %s1947_s2, %s1135_s8 }
  0x5f   : > { %s981_s15 = sshll.u32 %s1758_s5, 4  ;;  %s965_s18 = scalar_lea.sflag [#allocation6], %s1703_s16  ;;  %s1893_s15 = int_to_ptr.vmem [resolvable:$true] %s981_s15 }
  0x60   : > { %s1430_s26 = scalar_lea.vmem %s1893_s15, 256  ;;  %s1527_s12 = smov [#allocation9]  }
  0x61   : > { %1163 = vmatpush3.bf16.msra.mxu0 %v1731_v2  ;;  %1171 = vmatpush3.bf16.msra.mxu1 %v1731_v2  ;;  %p1431_p4 = scmp.ne.s32.totalorder %s1893_s15, %s1430_s26  ;;  %s1434_s27 = sshll.u32 %s1527_s12, 4  ;;  %s1435_s27 = int_to_ptr.vmem [resolvable:$false] %s1434_s27 }
  0x62   : > { %v224_v3 = vld [vmem:[#allocation2] sm:$0xff]  ;;  %1176 = vmatprep.subr.bf16.mxu0 %v1522_v0  ;;  %1184 = vmatprep.subr.bf16.mxu1 %v1522_v0  ;;  %v292_v13 = vld [vmem:[#allocation3] sm:$0xff]  ;;  %s1436_s22 = scalar_lea.vmem %s1435_s27, 512  ;;  %p1437_p12 = scmp.lt.s32.totalorder %s1893_s15, %s1435_s27 }
  0x63   : > { %v227_v4 = vpack.c.bf16 %v224_v3, %v224_v3  ;;  %p1432_p6 = pnand %p1431_p4, %p1644_p10  ;;  %p1438_p11 = scmp.lt.s32.totalorder %s1436_s22, %s1430_s26 }
  0x65   : > { %1165 = vmatmul.mubr.msk.bf16.vlgmr.msra.gmra.mrb[0].mxu0 %vm214_vm0, %v227_v4  ;;  %p1433_p8 = pneg %p1432_p6  ;;  %p1439_p0 = por %p1438_p11, %p1437_p12 }
  0x66   : > { %1177 = vmatpush3.bf16.msra.mxu0 %v1728_v1  ;;  %1180 = vmatprep.mubr.msk.bf16.mxu0 %vm1523_vm1, %v1522_v0 }
  0x67   : > { %1178 = vmatprep.subr.bf16.mxu0 %v1522_v0  ;;  %p1440_p5 = pnand %p1439_p0, %p1433_p8 }
  0x6a   : > { %1179 = vmatpush3.bf16.msra.mxu0 %v1731_v2 }
  0x6b   : > { %1192 = vmatprep.subr.bf16.mxu0 %v1522_v0 }
 0x138   : > { %v278_v7 = vpop.f32.mrb[0].mxu0 }
 0x139   : > { %v284_v8 = vadd.f32 %v278_v7, %v226_v6  ;;  %v1166_v9 = vpop.f32.mrb[1].mxu0 }
 0x13a   : > { %v281_v10 = vpop.f32.mrb[2].mxu0 }
 0x13b   : > { %1308 = vtanh.f32 %v284_v8  ;;  %v1167_v11 = vpop.f32.mrb[3].mxu0  ;;  %v1102_v14 = vmul.f32 -1.442695, %v284_v8 }
 0x13d   : > { %1310 = vpow2.f32 %v1102_v14 }
 0x145   : > { %v1309_v12 = vpop.eup %1308 }
 0x146   : > { %299 = vrot.lane.b32.xlu0 %v1309_v12, %s1524_s19 }
 0x147   : > { %v1311_v15 = vpop.eup %1310 }
 0x148   : > { %v288_v16 = vadd.f32 1.0, %v1311_v15 }
 0x14a   : > { %294 = vrot.lane.b32.xlu0 %v292_v13, %s1524_s19  ;;  %1312 = vrcp.f32 %v288_v16 }
 0x154   : > { %v1313_v17 = vpop.eup %1312 }
 0x1b8   : > { %v300_v18 = vpop.permute.xlu0 %299 }
 0x1b9   : > { %v302_v19 = vmul.f32 %v1313_v17, %v300_v18 }
 0x1bb   : > { %304 = vrot.lane.b32.xlu1 %v302_v19, %s1524_s19 }
 0x1bc   : > { %v295_v20 = vpop.permute.xlu0 %294 }
 0x1bd   : > { %v297_v21 = vmul.f32 %v1313_v17, %v295_v20 }
 0x22d   : > { %v305_v22 = vpop.permute.xlu1 %304 }
 0x22e   : > { %v307_v23 = vadd.f32 %v305_v22, %v297_v21  ;;  %v511_v22 = vunpack.c.h.bf16 %v1106_v57 }
 0x230   : > { %1314 = vtanh.f32 %v307_v23 }
 0x23a   : > { %v1315_v24 = vpop.eup %1314 }
 0x23b   : > { %310 = vrot.lane.b32.xlu1 %v1315_v24, %s1524_s19 }
 0x23f   : > { %315 = vrot.lane.b32.xlu1 %v307_v23, %s1525_s6 }
 0x2ad   : > { %v311_v25 = vpop.permute.xlu1 %310 }
 0x2ae   : > { %v313_v26 = vmul.f32 %v1313_v17, %v311_v25 }
 0x2b0   : > { %320 = vrot.lane.b32.xlu0 %v313_v26, %s1526_s7 }
 0x2b1   : > { %v316_v27 = vpop.permute.xlu1 %315 }
 0x2b2   : > { %318 = vst.msk [vmem:[#allocation3] sm:$0xff] %vm214_vm0, %v316_v27 }
 0x2b9   : > { %v381_v28 = vld [vmem:[#allocation3] sm:$0xff] }
 0x2ba   : > { %383 = vrot.lane.b32.xlu1 %v381_v28, %s1524_s19 }
 0x322   : > { %v321_v29 = vpop.permute.xlu0 %320 }
 0x323   : > { %323 = vst.msk [vmem:[#allocation2] sm:$0xff] %vm214_vm0, %v321_v29  ;;  %324 = vst.msk [vmem:[%s1758_s5] sm:$0xff] %vm214_vm0, %v321_v29 }
 0x32a   : > { %v325_v30 = vld [vmem:[#allocation2] sm:$0xff] }
 0x32b   : > { %v329_v31 = vpack.c.bf16 %v325_v30, %v325_v30 }
 0x32c   : > { %v384_v45 = vpop.permute.xlu1 %383 }
 0x32d   : > { %1173 = vmatmul.mubr.msk.bf16.vlgmr.msra.gmra.mrb[0].mxu1 %vm214_vm0, %v329_v31 }
 0x32e   : > { %1185 = vmatpush3.bf16.msra.mxu1 %v1728_v1  ;;  %1188 = vmatprep.mubr.msk.bf16.mxu1 %vm1523_vm1, %v1522_v0 }
 0x32f   : > { %1186 = vmatprep.subr.bf16.mxu1 %v1522_v0 }
 0x332   : > { %1187 = vmatpush3.bf16.msra.mxu1 %v1731_v2 }
 0x333   : > { %1200 = vmatprep.subr.bf16.mxu1 %v1522_v0 }
 0x400   : > { %v367_v33 = vpop.f32.mrb[0].mxu1 }
 0x401   : > { %v373_v34 = vadd.f32 %v367_v33, %v328_v32  ;;  %v1174_v35 = vpop.f32.mrb[1].mxu1 }
 0x402   : > { %v370_v36 = vpop.f32.mrb[2].mxu1 }
 0x403   : > { %1316 = vtanh.f32 %v373_v34  ;;  %v1175_v37 = vpop.f32.mrb[3].mxu1  ;;  %v1105_v39 = vmul.f32 -1.442695, %v373_v34 }
 0x405   : > { %1318 = vpow2.f32 %v1105_v39 }
 0x40d   : > { %v1317_v38 = vpop.eup %1316 }
 0x40e   : > { %388 = vrot.lane.b32.xlu0 %v1317_v38, %s1524_s19 }
 0x40f   : > { %v1319_v40 = vpop.eup %1318 }
 0x410   : > { %v377_v41 = vadd.f32 1.0, %v1319_v40 }
 0x412   : > { %1320 = vrcp.f32 %v377_v41 }
 0x41c   : > { %v1321_v42 = vpop.eup %1320 }
 0x41d   : > { %v386_v46 = vmul.f32 %v1321_v42, %v384_v45 }
 0x480   : > { %v389_v43 = vpop.permute.xlu0 %388 }
 0x481   : > { %v391_v44 = vmul.f32 %v1321_v42, %v389_v43 }
 0x483   : > { %393 = vrot.lane.b32.xlu0 %v391_v44, %s1524_s19 }
 0x4f5   : > { %v394_v47 = vpop.permute.xlu0 %393 }
 0x4f6   : > { %v396_v48 = vadd.f32 %v394_v47, %v386_v46  ;;  %v1112_v47 = vld [vmem:[%s1707_s29 + $0x10] sm:$0xff]  }
 0x4f8   : > { %1322 = vtanh.f32 %v396_v48 }
 0x502   : > { %v1323_v49 = vpop.eup %1322 }
 0x503   : > { %399 = vrot.lane.b32.xlu1 %v1323_v49, %s1524_s19 }
 0x507   : > { %404 = vrot.lane.b32.xlu1 %v396_v48, %s1525_s6  ;;  %v604_v48 = vunpack.c.l.bf16 %v1112_v47 }
 0x575   : > { %v400_v50 = vpop.permute.xlu1 %399 }
 0x576   : > { %v1773_v51 = vmul.f32 %v1321_v42, %v400_v50 }
 0x578   : > { %409 = vrot.lane.b32.xlu0 %v1773_v51, %s1526_s7 }
 0x579   : > { %v405_v52 = vpop.permute.xlu1 %404 }
 0x57a   : > { %407 = vst.msk [vmem:[#allocation3] sm:$0xff] %vm214_vm0, %v405_v52 }
 0x581   : > { %v474_v53 = vld [vmem:[#allocation3] sm:$0xff] }
 0x582   : > { %476 = vrot.lane.b32.xlu1 %v474_v53, %s1524_s19 }
 0x5ea   : > { %v410_v54 = vpop.permute.xlu0 %409 }
 0x5eb   : > { %412 = vst.msk [vmem:[#allocation2] sm:$0xff] %vm214_vm0, %v410_v54 }
 0x5f2   : > { %v418_v55 = vld [vmem:[#allocation2] sm:$0xff] }
 0x5f3   : > { %v422_v56 = vpack.c.bf16 %v418_v55, %v418_v55 }
 0x5f4   : > { %v477_v10 = vpop.permute.xlu1 %476 }
 0x5f5   : > { %1181 = vmatmul.mubr.msk.bf16.vlgmr.msra.gmra.mrb[4].mxu0 %vm214_vm0, %v422_v56 }
 0x5f6   : > { %1193 = vmatpush3.bf16.msra.mxu0 %v1728_v1  ;;  %1196 = vmatprep.mubr.msk.bf16.mxu0 %vm1523_vm1, %v1522_v0 }
 0x5f7   : > { %1194 = vmatprep.subr.bf16.mxu0 %v1522_v0 }
 0x5fa   : > { %1195 = vmatpush3.bf16.msra.mxu0 %v1731_v2 }
 0x5fb   : > { %1208 = vmatprep.subr.bf16.mxu0 %v1522_v0 }
 0x6c8   : > { %v460_v59 = vpop.f32.mrb[4].mxu0 }
 0x6c9   : > { %v466_v60 = vadd.f32 %v460_v59, %v421_v58  ;;  %v1182_v61 = vpop.f32.mrb[5].mxu0 }
 0x6ca   : > { %v463_v62 = vpop.f32.mrb[6].mxu0 }
 0x6cb   : > { %1324 = vtanh.f32 %v466_v60  ;;  %v1183_v63 = vpop.f32.mrb[7].mxu0  ;;  %v1108_v4 = vmul.f32 -1.442695, %v466_v60 }
 0x6cd   : > { %1326 = vpow2.f32 %v1108_v4 }
 0x6d5   : > { %v1325_v3 = vpop.eup %1324 }
 0x6d6   : > { %481 = vrot.lane.b32.xlu0 %v1325_v3, %s1524_s19 }
 0x6d7   : > { %v1327_v5 = vpop.eup %1326 }
 0x6d8   : > { %v470_v6 = vadd.f32 1.0, %v1327_v5 }
 0x6da   : > { %1328 = vrcp.f32 %v470_v6 }
 0x6e4   : > { %v1329_v7 = vpop.eup %1328 }
 0x6e5   : > { %v479_v11 = vmul.f32 %v1329_v7, %v477_v10 }
 0x748   : > { %v482_v8 = vpop.permute.xlu0 %481 }
 0x749   : > { %v484_v9 = vmul.f32 %v1329_v7, %v482_v8 }
 0x74b   : > { %486 = vrot.lane.b32.xlu0 %v484_v9, %s1524_s19 }
 0x7bd   : > { %v487_v12 = vpop.permute.xlu0 %486 }
 0x7be   : > { %v489_v13 = vadd.f32 %v487_v12, %v479_v11 }
 0x7c0   : > { %1330 = vtanh.f32 %v489_v13 }
 0x7ca   : > { %v1331_v14 = vpop.eup %1330 }
 0x7cb   : > { %492 = vrot.lane.b32.xlu1 %v1331_v14, %s1524_s19 }
 0x7cf   : > { %497 = vrot.lane.b32.xlu1 %v489_v13, %s1525_s6  ;;  %v694_v13 = vunpack.c.h.bf16 %v1112_v47 }
 0x83d   : > { %v493_v15 = vpop.permute.xlu1 %492 }
 0x83e   : > { %v1792_v16 = vmul.f32 %v1329_v7, %v493_v15 }
 0x840   : > { %502 = vrot.lane.b32.xlu0 %v1792_v16, %s1526_s7 }
 0x841   : > { %v498_v17 = vpop.permute.xlu1 %497 }
 0x842   : > { %500 = vst.msk [vmem:[#allocation3] sm:$0xff] %vm214_vm0, %v498_v17 }
 0x849   : > { %v564_v18 = vld [vmem:[#allocation3] sm:$0xff] }
 0x84a   : > { %566 = vrot.lane.b32.xlu1 %v564_v18, %s1524_s19 }
 0x8b2   : > { %v503_v19 = vpop.permute.xlu0 %502 }
 0x8b3   : > { %505 = vst.msk [vmem:[#allocation2] sm:$0xff] %vm214_vm0, %v503_v19 }
 0x8ba   : > { %v508_v20 = vld [vmem:[#allocation2] sm:$0xff] }
 0x8bb   : > { %v512_v21 = vpack.c.bf16 %v508_v20, %v508_v20 }
 0x8bc   : > { %v567_v35 = vpop.permute.xlu1 %566 }
 0x8bd   : > { %1189 = vmatmul.mubr.msk.bf16.vlgmr.msra.gmra.mrb[4].mxu1 %vm214_vm0, %v512_v21 }
 0x8be   : > { %1201 = vmatpush3.bf16.msra.mxu1 %v1728_v1  ;;  %1204 = vmatprep.mubr.msk.bf16.mxu1 %vm1523_vm1, %v1522_v0 }
 0x8bf   : > { %1202 = vmatprep.subr.bf16.mxu1 %v1522_v0 }
 0x8c2   : > { %1203 = vmatpush3.bf16.msra.mxu1 %v1731_v2 }
 0x8c3   : > { %1216 = vmatprep.subr.bf16.mxu1 %v1522_v0 }
 0x990   : > { %v550_v23 = vpop.f32.mrb[4].mxu1 }
 0x991   : > { %v556_v24 = vadd.f32 %v550_v23, %v511_v22  ;;  %v1190_v25 = vpop.f32.mrb[5].mxu1 }
 0x992   : > { %v553_v26 = vpop.f32.mrb[6].mxu1 }
 0x993   : > { %1332 = vtanh.f32 %v556_v24  ;;  %v1191_v27 = vpop.f32.mrb[7].mxu1  ;;  %v1111_v29 = vmul.f32 -1.442695, %v556_v24 }
 0x995   : > { %1334 = vpow2.f32 %v1111_v29 }
 0x99d   : > { %v1333_v28 = vpop.eup %1332 }
 0x99e   : > { %571 = vrot.lane.b32.xlu0 %v1333_v28, %s1524_s19 }
 0x99f   : > { %v1335_v30 = vpop.eup %1334 }
 0x9a0   : > { %v560_v31 = vadd.f32 1.0, %v1335_v30 }
 0x9a2   : > { %1336 = vrcp.f32 %v560_v31 }
 0x9ac   : > { %v1337_v32 = vpop.eup %1336 }
 0x9ad   : > { %v569_v36 = vmul.f32 %v1337_v32, %v567_v35 }
 0xa10   : > { %v572_v33 = vpop.permute.xlu0 %571 }
 0xa11   : > { %v574_v34 = vmul.f32 %v1337_v32, %v572_v33 }
 0xa13   : > { %576 = vrot.lane.b32.xlu0 %v574_v34, %s1524_s19 }
 0xa85   : > { %v577_v37 = vpop.permute.xlu0 %576 }
 0xa86   : > { %v579_v38 = vadd.f32 %v577_v37, %v569_v36  ;;  %v1120_v36 = vld [vmem:[%s1707_s29 + $0x18] sm:$0xff]  }
 0xa87   : > { %v786_v37 = vunpack.c.l.bf16 %v1120_v36 }
 0xa88   : > { %1338 = vtanh.f32 %v579_v38 }
 0xa92   : > { %v1339_v39 = vpop.eup %1338 }
 0xa93   : > { %582 = vrot.lane.b32.xlu1 %v1339_v39, %s1524_s19 }
 0xa97   : > { %587 = vrot.lane.b32.xlu1 %v579_v38, %s1525_s6 }
 0xb05   : > { %v583_v40 = vpop.permute.xlu1 %582 }
 0xb06   : > { %v1810_v41 = vmul.f32 %v1337_v32, %v583_v40 }
 0xb08   : > { %592 = vrot.lane.b32.xlu0 %v1810_v41, %s1526_s7 }
 0xb09   : > { %v588_v42 = vpop.permute.xlu1 %587 }
 0xb0a   : > { %590 = vst.msk [vmem:[#allocation3] sm:$0xff] %vm214_vm0, %v588_v42 }
 0xb11   : > { %v657_v43 = vld [vmem:[#allocation3] sm:$0xff] }
 0xb12   : > { %659 = vrot.lane.b32.xlu1 %v657_v43, %s1524_s19 }
 0xb7a   : > { %v593_v44 = vpop.permute.xlu0 %592 }
 0xb7b   : > { %595 = vst.msk [vmem:[#allocation2] sm:$0xff] %vm214_vm0, %v593_v44 }
 0xb82   : > { %v601_v45 = vld [vmem:[#allocation2] sm:$0xff] }
 0xb83   : > { %v605_v46 = vpack.c.bf16 %v601_v45, %v601_v45 }
 0xb84   : > { %v660_v62 = vpop.permute.xlu1 %659 }
 0xb85   : > { %1197 = vmatmul.mubr.msk.bf16.vlgmr.msra.gmra.mrb[8].mxu0 %vm214_vm0, %v605_v46 }
 0xb86   : > { %1209 = vmatpush3.bf16.msra.mxu0 %v1728_v1  ;;  %1212 = vmatprep.mubr.msk.bf16.mxu0 %vm1523_vm1, %v1522_v0 }
 0xb87   : > { %1210 = vmatprep.subr.bf16.mxu0 %v1522_v0 }
 0xb8a   : > { %1211 = vmatpush3.bf16.msra.mxu0 %v1731_v2 }
 0xc58   : > { %v643_v49 = vpop.f32.mrb[8].mxu0 }
 0xc59   : > { %v649_v50 = vadd.f32 %v643_v49, %v604_v48  ;;  %v1198_v52 = vpop.f32.mrb[9].mxu0 }
 0xc5a   : > { %v646_v53 = vpop.f32.mrb[10].mxu0 }
 0xc5b   : > { %1340 = vtanh.f32 %v649_v50  ;;  %v1199_v54 = vpop.f32.mrb[11].mxu0  ;;  %v1114_v56 = vmul.f32 -1.442695, %v649_v50 }
 0xc5d   : > { %1342 = vpow2.f32 %v1114_v56 }
 0xc65   : > { %v1341_v55 = vpop.eup %1340 }
 0xc66   : > { %664 = vrot.lane.b32.xlu0 %v1341_v55, %s1524_s19 }
 0xc67   : > { %v1343_v57 = vpop.eup %1342 }
 0xc68   : > { %v653_v58 = vadd.f32 1.0, %v1343_v57 }
 0xc6a   : > { %1344 = vrcp.f32 %v653_v58 }
 0xc74   : > { %v1345_v59 = vpop.eup %1344 }
 0xc75   : > { %v662_v63 = vmul.f32 %v1345_v59, %v660_v62 }
 0xcd8   : > { %v665_v60 = vpop.permute.xlu0 %664 }
 0xcd9   : > { %v667_v61 = vmul.f32 %v1345_v59, %v665_v60 }
 0xcdb   : > { %669 = vrot.lane.b32.xlu0 %v667_v61, %s1524_s19 }
 0xd4d   : > { %v670_v3 = vpop.permute.xlu0 %669 }
 0xd4e   : > { %v672_v4 = vadd.f32 %v670_v3, %v662_v63  ;;  %v875_v3 = vunpack.c.h.bf16 %v1120_v36 }
 0xd50   : > { %1346 = vtanh.f32 %v672_v4 }
 0xd5a   : > { %v1347_v5 = vpop.eup %1346 }
 0xd5b   : > { %675 = vrot.lane.b32.xlu1 %v1347_v5, %s1524_s19 }
 0xd5f   : > { %680 = vrot.lane.b32.xlu1 %v672_v4, %s1525_s6 }
 0xdcd   : > { %v676_v6 = vpop.permute.xlu1 %675 }
 0xdce   : > { %v678_v7 = vmul.f32 %v1345_v59, %v676_v6 }
 0xdd0   : > { %685 = vrot.lane.b32.xlu0 %v678_v7, %s1526_s7 }
 0xdd1   : > { %v681_v8 = vpop.permute.xlu1 %680 }
 0xdd2   : > { %683 = vst.msk [vmem:[#allocation3] sm:$0xff] %vm214_vm0, %v681_v8 }
 0xdd9   : > { %v747_v9 = vld [vmem:[#allocation3] sm:$0xff] }
 0xdda   : > { %749 = vrot.lane.b32.xlu1 %v747_v9, %s1524_s19 }
 0xe42   : > { %v686_v10 = vpop.permute.xlu0 %685 }
 0xe43   : > { %688 = vst.msk [vmem:[#allocation2] sm:$0xff] %vm214_vm0, %v686_v10  ;;  %1115 = vst.msk [vmem:[%s1758_s5 + $0x8] sm:$0xff] %vm214_vm0, %v686_v10 }
 0xe4a   : > { %v691_v11 = vld [vmem:[#allocation2] sm:$0xff] }
 0xe4b   : > { %v695_v12 = vpack.c.bf16 %v691_v11, %v691_v11 }
 0xe4d   : > { %1205 = vmatmul.mubr.msk.bf16.vlgmr.msra.gmra.mrb[8].mxu1 %vm214_vm0, %v695_v12 }
 0xe4e   : > { %1217 = vmatpush3.bf16.msra.mxu1 %v1728_v1  ;;  %1220 = vmatprep.mubr.msk.bf16.mxu1 %vm1523_vm1, %v1522_v0 }
 0xe4f   : > { %1218 = vmatprep.subr.bf16.mxu1 %v1522_v0 }
 0xe52   : > { %1219 = vmatpush3.bf16.msra.mxu1 %v1731_v2  ;;  %v750_v2 = vpop.permute.xlu1 %749 }
 0xf20   : > { %v733_v14 = vpop.f32.mrb[8].mxu1 }
 0xf21   : > { %v739_v15 = vadd.f32 %v733_v14, %v694_v13  ;;  %v1206_v17 = vpop.f32.mrb[9].mxu1 }
 0xf22   : > { %v736_v18 = vpop.f32.mrb[10].mxu1 }
 0xf23   : > { %1348 = vtanh.f32 %v739_v15  ;;  %v1207_v19 = vpop.f32.mrb[11].mxu1  ;;  %v1118_v21 = vmul.f32 -1.442695, %v739_v15 }
 0xf25   : > { %1350 = vpow2.f32 %v1118_v21 }
 0xf2d   : > { %v1349_v20 = vpop.eup %1348 }
 0xf2e   : > { %754 = vrot.lane.b32.xlu0 %v1349_v20, %s1524_s19 }
 0xf2f   : > { %v1351_v1 = vpop.eup %1350 }
 0xf30   : > { %v743_v22 = vadd.f32 1.0, %v1351_v1 }
 0xf32   : > { %1352 = vrcp.f32 %v743_v22 }
 0xf3c   : > { %v1353_v23 = vpop.eup %1352 }
 0xf3d   : > { %v752_v25 = vmul.f32 %v1353_v23, %v750_v2 }
 0xfa0   : > { %v755_v24 = vpop.permute.xlu0 %754 }
 0xfa1   : > { %v757_v0 = vmul.f32 %v1353_v23, %v755_v24 }
 0xfa3   : > { %759 = vrot.lane.b32.xlu0 %v757_v0, %s1524_s19 }
0x1015   : > { %v760_v26 = vpop.permute.xlu0 %759 }
0x1016   : > { %v762_v27 = vadd.f32 %v760_v26, %v752_v25 }
0x1018   : > { %1354 = vtanh.f32 %v762_v27 }
0x1022   : > { %v1355_v28 = vpop.eup %1354 }
0x1023   : > { %765 = vrot.lane.b32.xlu1 %v1355_v28, %s1524_s19 }
0x1027   : > { %770 = vrot.lane.b32.xlu1 %v762_v27, %s1525_s6 }
0x1095   : > { %v766_v29 = vpop.permute.xlu1 %765 }
0x1096   : > { %v1844_v30 = vmul.f32 %v1353_v23, %v766_v29 }
0x1098   : > { %775 = vrot.lane.b32.xlu0 %v1844_v30, %s1526_s7 }
0x1099   : > { %v771_v31 = vpop.permute.xlu1 %770 }
0x109a   : > { %773 = vst.msk [vmem:[#allocation3] sm:$0xff] %vm214_vm0, %v771_v31 }
0x10a1   : > { %v839_v32 = vld [vmem:[#allocation3] sm:$0xff] }
0x10a2   : > { %841 = vrot.lane.b32.xlu1 %v839_v32, %s1524_s19 }
0x110a   : > { %v776_v33 = vpop.permute.xlu0 %775 }
0x110b   : > { %778 = vst.msk [vmem:[#allocation2] sm:$0xff] %vm214_vm0, %v776_v33 }
0x1112   : > { %v783_v34 = vld [vmem:[#allocation2] sm:$0xff] }
0x1113   : > { %v787_v35 = vpack.c.bf16 %v783_v34, %v783_v34 }
0x1114   : > { %v842_v52 = vpop.permute.xlu1 %841 }
0x1115   : > { %1213 = vmatmul.mubr.msk.bf16.vlgmr.msra.gmra.mrb[12].mxu0 %vm214_vm0, %v787_v35 }
0x11e8   : > { %v825_v38 = vpop.f32.mrb[12].mxu0 }
0x11e9   : > { %v831_v39 = vadd.f32 %v825_v38, %v786_v37  ;;  %v1214_v40 = vpop.f32.mrb[13].mxu0 }
0x11ea   : > { %v828_v42 = vpop.f32.mrb[14].mxu0 }
0x11eb   : > { %1356 = vtanh.f32 %v831_v39  ;;  %v1215_v43 = vpop.f32.mrb[15].mxu0  ;;  %v1122_v45 = vmul.f32 -1.442695, %v831_v39 }
0x11ed   : > { %1358 = vpow2.f32 %v1122_v45 }
0x11f5   : > { %v1357_v44 = vpop.eup %1356 }
0x11f6   : > { %846 = vrot.lane.b32.xlu0 %v1357_v44, %s1524_s19 }
0x11f7   : > { %v1359_v46 = vpop.eup %1358 }
0x11f8   : > { %v835_v47 = vadd.f32 1.0, %v1359_v46 }
0x11fa   : > { %1360 = vrcp.f32 %v835_v47 }
0x1204   : > { %v1361_v48 = vpop.eup %1360 }
0x1205   : > { %v844_v53 = vmul.f32 %v1361_v48, %v842_v52 }
0x1268   : > { %v847_v49 = vpop.permute.xlu0 %846 }
0x1269   : > { %v849_v50 = vmul.f32 %v1361_v48, %v847_v49 }
0x126b   : > { %851 = vrot.lane.b32.xlu0 %v849_v50, %s1524_s19 }
0x12dd   : > { %v852_v54 = vpop.permute.xlu0 %851 }
0x12de   : > { %v854_v55 = vadd.f32 %v852_v54, %v844_v53 }
0x12e0   : > { %1362 = vtanh.f32 %v854_v55 }
0x12ea   : > { %v1363_v56 = vpop.eup %1362 }
0x12eb   : > { %857 = vrot.lane.b32.xlu1 %v1363_v56, %s1524_s19 }
0x12ef   : > { %862 = vrot.lane.b32.xlu1 %v854_v55, %s1525_s6 }
0x135d   : > { %v858_v57 = vpop.permute.xlu1 %857 }
0x135e   : > { %v860_v58 = vmul.f32 %v1361_v48, %v858_v57 }
0x1360   : > { %867 = vrot.lane.b32.xlu0 %v860_v58, %s1526_s7 }
0x1361   : > { %v863_v59 = vpop.permute.xlu1 %862 }
0x1362   : > { %865 = vst.msk [vmem:[#allocation3] sm:$0xff] %vm214_vm0, %v863_v59 }
0x1369   : > { %v928_v60 = vld [vmem:[#allocation3] sm:$0xff] }
0x136a   : > { %930 = vrot.lane.b32.xlu1 %v928_v60, %s1524_s19 }
0x13d2   : > { %v868_v61 = vpop.permute.xlu0 %867 }
0x13d3   : > { %870 = vst.msk [vmem:[#allocation2] sm:$0xff] %vm214_vm0, %v868_v61 }
0x13da   : > { %v872_v62 = vld [vmem:[#allocation2] sm:$0xff] }
0x13db   : > { %v876_v63 = vpack.c.bf16 %v872_v62, %v872_v62 }
0x13dc   : > { %v931_v17 = vpop.permute.xlu1 %930 }
0x13dd   : > { %1221 = vmatmul.mubr.msk.bf16.vlgmr.msra.gmra.mrb[12].mxu1 %vm214_vm0, %v876_v63 }
0x14b0   : > { %v914_v4 = vpop.f32.mrb[12].mxu1 }
0x14b1   : > { %v920_v5 = vadd.f32 %v914_v4, %v875_v3  ;;  %v1222_v6 = vpop.f32.mrb[13].mxu1 }
0x14b2   : > { %v917_v7 = vpop.f32.mrb[14].mxu1 }
0x14b3   : > { %1364 = vtanh.f32 %v920_v5  ;;  %v1223_v8 = vpop.f32.mrb[15].mxu1  ;;  %v1126_v10 = vmul.f32 -1.442695, %v920_v5 }
0x14b5   : > { %1366 = vpow2.f32 %v1126_v10 }
0x14bd   : > { %v1365_v9 = vpop.eup %1364 }
0x14be   : > { %935 = vrot.lane.b32.xlu0 %v1365_v9, %s1524_s19 }
0x14bf   : > { %v1367_v11 = vpop.eup %1366 }
0x14c0   : > { %v924_v12 = vadd.f32 1.0, %v1367_v11 }
0x14c2   : > { %1368 = vrcp.f32 %v924_v12 }
0x14cc   : > { %v1369_v13 = vpop.eup %1368 }
0x14cd   : > { %v933_v18 = vmul.f32 %v1369_v13, %v931_v17 }
0x1530   : > { %v936_v14 = vpop.permute.xlu0 %935 }
0x1531   : > { %v938_v15 = vmul.f32 %v1369_v13, %v936_v14 }
0x1533   : > { %940 = vrot.lane.b32.xlu0 %v938_v15, %s1524_s19 }
0x1537   : > { %413 = vrot.lane.b32.xlu0 %v1773_v51, %s1525_s6 }
0x153b   : > { %596 = vrot.lane.b32.xlu0 %v1810_v41, %s1524_s19 }
0x15a5   : > { %v941_v19 = vpop.permute.xlu0 %940 }
0x15a6   : > { %v943_v20 = vadd.f32 %v941_v19, %v933_v18 }
0x15a8   : > { %1370 = vtanh.f32 %v943_v20  ;;  %951 = vrot.lane.b32.xlu0 %v943_v20, %s1525_s6 }
0x15a9   : > { %v414_v21 = vpop.permute.xlu0 %413 }
0x15aa   : > { %417 = vst.msk [vmem:[%s1758_s5] sm:$0xff] %vm416_vm2, %v414_v21 }
0x15ab   : > { %507 = vst.msk [vmem:[%s1758_s5] sm:$0xff] %vm506_vm3, %v1792_v16 }
0x15ad   : > { %v597_v51 = vpop.permute.xlu0 %596 }
0x15ae   : > { %600 = vst.msk [vmem:[%s1758_s5] sm:$0xff] %vm599_vm4, %v597_v51 }
0x15b2   : > { %v1371_v41 = vpop.eup %1370 }
0x15b3   : > { %946 = vrot.lane.b32.xlu1 %v1371_v41, %s1524_s19 }
0x15b7   : > { %779 = vrot.lane.b32.xlu1 %v1844_v30, %s1525_s6 }
0x161a   : > { %v952_v1 = vpop.permute.xlu0 %951 }
0x161b   : > { %954 = vst.msk [vmem:[#allocation3] sm:$0xff] %vm214_vm0, %v952_v1 }
0x1625   : > { %v947_v22 = vpop.permute.xlu1 %946 }
0x1626   : > { %v949_v16 = vmul.f32 %v1369_v13, %v947_v22 }
0x1628   : > { %960 = vrot.lane.b32.xlu1 %v949_v16, %s1524_s19 }
0x1629   : > { %v780_v23 = vpop.permute.xlu1 %779 }
0x162a   : > { %1119 = vst.msk [vmem:[%s1758_s5 + $0x8] sm:$0xff] %vm416_vm2, %v780_v23 }
0x162b   : > { %1123 = vst.msk [vmem:[%s1758_s5 + $0x8] sm:$0xff] %vm506_vm3, %v860_v58 }
0x162c   : > { %956 = vrot.lane.b32.xlu1 %v949_v16, %s1526_s7 }
0x169a   : > { %v961_v24 = vpop.permute.xlu1 %960 }
0x169b   : > { %1127 = vst.msk [vmem:[%s1758_s5 + $0x8] sm:$0xff] %vm599_vm4, %v961_v24 }
0x169c   : > { %1443 = shalt.err (!%p1440_p5)
}
0x169d   : > { %s1444_s29 = scalar_lea.hbm %s1891_s3, 256  ;;  %s1448_s19 = scalar_lea.hbm %s1947_s2, 512 }
0x169e   : > { %p1445_p9 = scmp.ne.s32.totalorder %s1891_s3, %s1444_s29  ;;  %p1449_p3 = scmp.lt.u32.totalorder %s1891_s3, %s1947_s2 }
0x169f   : > { %p1450_p7 = scmp.lt.u32.totalorder %s1448_s19, %s1444_s29  ;;  %p1452_p4 = scmp.lt.u32.totalorder %s1444_s29, %s1891_s3 }
0x16a0   : > { %p1446_p1 = pnand %p1445_p9, %p1644_p10 }
0x16a1   : > { %p1451_p13 = por %p1450_p7, %p1449_p3 }
0x16a2   : > { %p1447_p2 = pneg %p1446_p1 }
0x16a3   : > { %p1453_p6 = por %p1452_p4, %p1451_p13 }
0x16a5   : > { %p1454_p8 = pnand %p1453_p6, %p1447_p2 }
0x16a7   : > { %1457 = shalt.err (!%p1454_p8)
}
0x16a8   : > { %s1528_s4 = smov 128   ;;  %s1529_s5 = smov 8   ;;  %v957_v0 = vpop.permute.xlu1 %956 }
0x16a9   : > { %1230 = dma.vmem_to_hbm [thread:$0]  (%p1644_p10), %s1893_s15, 256, %s1891_s3, %s965_s18, %s1528_s4, %s1528_s4, %s1529_s5   ;;  %959 = vst.msk [vmem:[#allocation2] sm:$0xff] %vm214_vm0, %v957_v0 }
0x16aa PF: > { %s996_s8 = sand.u32 1, %s1496_s9   ;;  %p1965_p12 = scmp.ne.s32.totalorder %s1955_s20, 0 }
0x16ab   : > { %p1966_p11 = scmp.ge.s32.totalorder %s1516_s14, 2  ;;  %s997_s30 = scalar_lea.sflag [#allocation6], %s996_s8 }
0x16ad   : > { %p1241_p0 = pnand %p1966_p11, %p1965_p12 }
0x16af   : > { %1491 = dma.done.wait (!%p1241_p0), %s997_s30, 256  }
0x16b0   : > { %1493 = vsyncadd (!%p1241_p0), %s997_s30, 4294967040  ;;  %s19_s14 = sadd.s32 1, %s1516_s14   ;;  %s1967_s9 = smov %s1500_s10 }
0x16b1   : > { %p16_p5 = scmp.ge.s32.totalorder %s19_s14, 4   ;;  %s1968_s10 = smov %s1504_s11 }
0x16b2   : > { %s1969_s11 = smov %s1653_s28  ;;  %s1970_s12 = smov %s1512_s13 }
0x16b3   : > { %s1971_s13 = smov %s1973_s25  ;;  %18 = sbr.rel (!%p16_p5) target bundleno = 7 (0x7), region = 90 }
0x16ba   :  { %1002 = vsyncpa [#allocation5], 1 }
0x16bb   :  { %1004 = vsyncpa [#allocation5 + $0x1], 1 }
0x16bc   :  { %1005 = vsyncpa [#allocation8], 1 }
0x16bd   :  { %1006 = vsyncpa [#allocation6], 1 }
0x16be   :  { %1008 = vsyncpa [#allocation6 + $0x1], 1 }

</bundles_post_ra>
